<compile_context>
chip_gen: v5e
topology: v5e:2x2
jax: 0.10.0
libtpu: 0.0.40
codegen_flags: <defaults>
</compile_context>

<pallas_src>
import functools

import jax
import jax.numpy as jnp
from jax import lax
from jax.experimental import pallas as pl
from jax.experimental.pallas import tpu as pltpu

LANES = 128

VGG_CFGS = {
    "vgg16": [16, 16, "M", 32, 32, "M", 64, 64, 64, "M",
              128, 128, 128, "M", 128, 128, 128, "M"],
    "vgg19": [16, 16, "M", 32, 32, "M", 64, 64, 64, 64, "M",
              128, 128, 128, 128, "M", 128, 128, 128, 128, "M"],
}


# ------------------------------ small helpers -------------------------------

def _round_up(x, m):
    return (x + m - 1) // m * m


def _row_tile(h, w):
    """Largest divisor th of h such that (th*w) is a legal sublane tile (multiple of 8 or the
    full extent) and th*w stays around <=128 GEMM rows (good M tile on v5e/v6e/v7x)."""
    target = max(1, 128 // max(w, 1))
    cands = [t for t in range(1, h + 1)
             if h % t == 0 and (t == h or (t * w) % 8 == 0)]
    le = [t for t in cands if t <= target]
    return max(le) if le else min(cands)


def _pool_row_tile(ho):
    best = 1
    for t in range(1, ho + 1):
        if ho % t == 0 and t <= 8:
            best = t
    return best


# ------------------------------ Pallas kernels ------------------------------

def _conv3x3_kernel(apply_relu, th, width, cpin, cpout,
                    x_ref, w_ref, b_ref, o_ref):
    # x_ref: ((H+2)*W + 2, cpin) f32   flattened H-padded image (+1 guard each end),
    #                                  resident across the row-tile axis.
    # w_ref: (9, cpin, cpout)    bf16  per-tap weight matrices (dy*3 + dx).
    # b_ref: (1, cpout)          f32
    # o_ref: (th*width, cpout)   f32   lane-dense output slab for this row tile.
    tm = th * width
    base = pl.program_id(1) * tm  # = h0 * width

    col = lax.broadcasted_iota(jnp.int32, (tm, 1), 0) % width
    not_left = col != 0
    not_right = col != (width - 1)

    acc = jnp.zeros((tm, cpout), jnp.float32)
    for dy in range(3):
        for dx in range(3):
            start = base + dy * width + dx
            patch = x_ref[pl.ds(start, tm), :]
            if dx == 0:
                patch = jnp.where(not_left, patch, 0.0)
            elif dx == 2:
                patch = jnp.where(not_right, patch, 0.0)
            acc = acc + jnp.dot(patch.astype(jnp.bfloat16),
                                w_ref[dy * 3 + dx],
                                preferred_element_type=jnp.float32)
    acc = acc + b_ref[...]
    if apply_relu:
        acc = jnp.maximum(acc, 0.0)
    o_ref[...] = acc.astype(o_ref.dtype)


def _maxpool_kernel(cp, x_ref, o_ref):
    # x_ref: (tho, 2, Wo, 2*cp) — one contiguous block of the reshaped activation.
    # o_ref: (tho, Wo, cp)
    x = x_ref[...]
    m = jnp.maximum(x[:, 0], x[:, 1])            # max over H pairs
    o_ref[...] = jnp.maximum(m[:, :, :cp], m[:, :, cp:])  # max over W pairs (128-aligned)


def _relu_kernel(x_ref, o_ref):
    o_ref[...] = jnp.maximum(x_ref[...], 0.0)


# ------------------------------ op wrappers ---------------------------------

def conv3x3(x, w_taps, bias_p, apply_relu=True):
    """3x3 SAME conv (+ fused bias / optional ReLU).
    x: (N, H, W, CPin) f32 with channel padding; w_taps: (9, CPin, CPout) bf16;
    bias_p: (1, CPout) f32."""
    N, H, W, CPin = x.shape
    CPout = w_taps.shape[2]

    # Zero-pad H only, flatten spatial, add a 1-element guard on each end of the flat dim
    # so all 9 shifted reads stay in bounds.  No im2col duplication.
    xp = jnp.pad(x, ((0, 0), (1, 1), (0, 0), (0, 0)))
    xf = jnp.pad(xp.reshape(N, (H + 2) * W, CPin), ((0, 0), (1, 1), (0, 0)))
    Lp = (H + 2) * W + 2

    th = _row_tile(H, W)
    tm = th * W
    grid = (N, H // th)

    flops = int(2 * N * H * W * 9 * CPin * CPout)
    bytes_accessed = int(xf.size * 4 + w_taps.size * 2 + bias_p.size * 4
                         + N * H * W * CPout * 4)

    out = pl.pallas_call(
        functools.partial(_conv3x3_kernel, apply_relu, th, W, CPin, CPout),
        out_shape=jax.ShapeDtypeStruct((N, H * W, CPout), jnp.float32),
        grid=grid,
        in_specs=[
            # Full padded image per batch element (block revisited across the row-tile axis).
            pl.BlockSpec((None, Lp, CPin), lambda n, i: (n, 0, 0)),
            pl.BlockSpec((9, CPin, CPout), lambda n, i: (0, 0, 0)),
            pl.BlockSpec((1, CPout), lambda n, i: (0, 0)),
        ],
        out_specs=pl.BlockSpec((None, tm, CPout), lambda n, i: (n, i, 0)),
        compiler_params=pltpu.CompilerParams(
            dimension_semantics=("parallel", "parallel"),
            vmem_limit_bytes=32 * 1024 * 1024),
        cost_estimate=pl.CostEstimate(flops=flops, transcendentals=0,
                                      bytes_accessed=bytes_accessed),
    )(xf, w_taps, bias_p)
    return out.reshape(N, H, W, CPout)


def maxpool2x2(x):
    """2x2 max-pool, stride 2.  x: (N, H, W, CP) with even H, W and CP % 128 == 0."""
    N, H, W, CP = x.shape
    Ho, Wo = H // 2, W // 2
    xr = x.reshape(N, Ho, 2, Wo, 2 * CP)   # free, contiguous reshape (no data movement)
    tho = _pool_row_tile(Ho)
    grid = (N, Ho // tho)
    return pl.pallas_call(
        functools.partial(_maxpool_kernel, CP),
        out_shape=jax.ShapeDtypeStruct((N, Ho, Wo, CP), x.dtype),
        grid=grid,
        in_specs=[pl.BlockSpec((None, tho, 2, Wo, 2 * CP),
                               lambda n, i: (n, i, 0, 0, 0))],
        out_specs=pl.BlockSpec((None, tho, Wo, CP), lambda n, i: (n, i, 0, 0)),
        compiler_params=pltpu.CompilerParams(
            dimension_semantics=("parallel", "parallel"),
            vmem_limit_bytes=32 * 1024 * 1024),
    )(xr)


def relu(x):
    """Standalone ReLU — only used when a slice boundary splits a conv/relu pair."""
    N, H, W, CP = x.shape
    xf = x.reshape(N, H * W, CP)
    out = pl.pallas_call(
        _relu_kernel,
        out_shape=jax.ShapeDtypeStruct(xf.shape, x.dtype),
        grid=(N,),
        in_specs=[pl.BlockSpec((None, H * W, CP), lambda n: (n, 0, 0))],
        out_specs=pl.BlockSpec((None, H * W, CP), lambda n: (n, 0, 0)),
        compiler_params=pltpu.CompilerParams(dimension_semantics=("parallel",)),
    )(xf)
    return out.reshape(N, H, W, CP)


# ------------------------------ VGG module ----------------------------------

def _pack_conv_weights(w):
    """OIHW (Cout, Cin, 3, 3) -> (9, CPin, CPout) bf16 per-tap matrices, tap = dy*3 + dx."""
    cout, cin = w.shape[0], w.shape[1]
    cpin, cpout = _round_up(cin, LANES), _round_up(cout, LANES)
    taps = jnp.transpose(w, (2, 3, 1, 0)).reshape(9, cin, cout)  # (dy, dx, cin, cout)
    taps = jnp.pad(taps, ((0, 0), (0, cpin - cin), (0, cpout - cout)))
    return taps.astype(jnp.bfloat16)


def _pack_bias(b):
    cout = b.shape[0]
    cpout = _round_up(cout, LANES)
    return jnp.pad(b, (0, cpout - cout)).reshape(1, cpout).astype(jnp.float32)


class VGG:
    """JAX/Pallas port of the PyTorch VGG perceptual-loss feature extractor."""

    def __init__(self, vgg_name, feature_layers, key):
        assert vgg_name in ("vgg16", "vgg19")
        assert len(feature_layers) == 5
        self.feature_layers = tuple(feature_layers)
        self.N_slices = 5
        self.layers = []
        c = 3
        for v in VGG_CFGS[vgg_name]:
            if v == "M":
                self.layers.append(("pool", None))
            else:
                key, kw, kb = jax.random.split(key, 3)
                fan_in = c * 9
                w = (jax.random.normal(kw, (v, c, 3, 3), jnp.float32)
                     * (2.0 / fan_in) ** 0.5)
                b = 0.01 * jax.random.normal(kb, (v,), jnp.float32)
                params = {"w": w, "b": b, "cin": c, "cout": v,
                          "w_taps": _pack_conv_weights(w), "bias_p": _pack_bias(b)}
                self.layers.append(("conv", params))
                self.layers.append(("relu", None))
                c = v
        assert self.feature_layers[-1] <= len(self.layers)

    def _run_slice(self, x, start, end, c_real):
        i = start
        while i < end:
            kind, p = self.layers[i]
            if kind == "conv":
                fuse = (i + 1 < end) and self.layers[i + 1][0] == "relu"
                x = conv3x3(x, p["w_taps"], p["bias_p"], apply_relu=fuse)
                c_real = p["cout"]
                i += 2 if fuse else 1
            elif kind == "relu":
                x = relu(x)
                i += 1
            else:
                x = maxpool2x2(x)
                i += 1
        return x, c_real

    def __call__(self, x_nchw):
        # NCHW (PyTorch) -> NHWC, channels zero-padded to a multiple of 128 lanes.
        x = jnp.transpose(x_nchw.astype(jnp.float32), (0, 2, 3, 1))
        c_real = x.shape[-1]
        cp = _round_up(c_real, LANES)
        x = jnp.pad(x, ((0, 0), (0, 0), (0, 0), (0, cp - c_real)))
        feats, start = [], 0
        for end in self.feature_layers:
            x, c_real = self._run_slice(x, start, end, c_real)
            feats.append(jnp.transpose(x[..., :c_real], (0, 3, 1, 2)))  # back to NCHW
            start = end
        return feats  # [h_relu1, h_relu2, h_relu3, h_relu4, h_relu5]


# ----------------------- pure-JAX reference (checking) ----------------------
# Mirrors the kernel's numerics (bf16 matmul inputs, f32 accumulation/epilogue) so the check
# validates the kernel implementation rather than the precision choice.

def reference_forward(model, x_nchw):
    x = jnp.transpose(x_nchw.astype(jnp.float32), (0, 2, 3, 1))
    feats, start = [], 0
    for end in model.feature_layers:
        for i in range(start, end):
            kind, p = model.layers[i]
            if kind == "conv":
                w_hwio = jnp.transpose(p["w"], (2, 3, 1, 0)).astype(jnp.bfloat16)
                y = lax.conv_general_dilated(
                    x.astype(jnp.bfloat16), w_hwio, (1, 1), "SAME",
                    dimension_numbers=("NHWC", "HWIO", "NHWC"),
                    preferred_element_type=jnp.float32)
                x = y + p["b"]
            elif kind == "relu":
                x = jnp.maximum(x, 0.0)
            else:
                x = lax.reduce_window(x, -jnp.inf, lax.max,
                                      (1, 2, 2, 1), (1, 2, 2, 1), "VALID")
        feats.append(jnp.transpose(x, (0, 3, 1, 2)))
        start = end
    return feats


if __name__ == "__main__":
    key = jax.random.PRNGKey(0)
    kx, kp = jax.random.split(key)

    # Small input consistent with the module: NCHW, 3-channel image.
    x = jax.random.normal(kx, (2, 3, 16, 16), jnp.float32)

    # vgg16 with the standard perceptual-loss boundaries
    # (relu1_2, relu2_2, relu3_3, relu4_3, relu5_3).
    model = VGG("vgg16", (4, 9, 16, 23, 30), kp)

    feats = model(x)
    feats = [jax.block_until_ready(f) for f in feats]

    expected_shapes = [(2, 16, 16, 16), (2, 32, 8, 8), (2, 64, 4, 4),
                       (2, 128, 2, 2), (2, 128, 1, 1)]
    assert [tuple(f.shape) for f in feats] == expected_shapes, \
        [tuple(f.shape) for f in feats]

    refs = reference_forward(model, x)
    for f, r in zip(feats, refs):
        scale = float(jnp.max(jnp.abs(r))) + 1e-6
        err = float(jnp.max(jnp.abs(f - r)))
        assert err <= 2e-2 * scale, (err, scale)

    print("KERNEL_OK")
</pallas_src>

<mosaic_0001>
module attributes {stable_mosaic.version = 11 : i64} {
  func.func @_conv3x3_kernel(%arg0: i32, %arg1: i32, %arg2: memref<1x290x128xf32, #tpu.memory_space<vmem>>, %arg3: memref<9x128x128xbf16, #tpu.memory_space<vmem>>, %arg4: memref<1x128xf32, #tpu.memory_space<vmem>>, %arg5: memref<1x128x128xf32, #tpu.memory_space<vmem>>) attributes {dimension_semantics = [#tpu.dimension_semantics<parallel>, #tpu.dimension_semantics<parallel>], iteration_bounds = array<i64: 2, 2>, scalar_prefetch = 0 : i64, scratch_operands = 0 : i64, tpu.core_type = #tpu.core_type<tc>, window_params = [{transform_indices = @transform_0, window_bounds = array<i64: 1, 290, 128>}, {pipeline_mode = #tpu.pipeline_mode<synchronous>, transform_indices = @transform_1, window_bounds = array<i64: 9, 128, 128>}, {pipeline_mode = #tpu.pipeline_mode<synchronous>, transform_indices = @transform_2, window_bounds = array<i64: 1, 128>}, {transform_indices = @transform_3, window_bounds = array<i64: 1, 128, 128>}]} {
    %c128_i32 = arith.constant 128 : i32
    %0 = arith.muli %arg1, %c128_i32 : i32
    %1 = tpu.iota {dimensions = array<i32: 0>} : vector<128x1xi32>
    %c16_i32 = arith.constant 16 : i32
    %c0_i32 = arith.constant 0 : i32
    %2 = arith.cmpi eq, %c16_i32, %c0_i32 : i32
    %c1_i32 = arith.constant 1 : i32
    %3 = arith.select %2, %c1_i32, %c16_i32 : i32
    %4 = vector.broadcast %3 : i32 to vector<128x1xi32>
    %5 = arith.remsi %1, %4 : vector<128x1xi32>
    %c0_i32_0 = arith.constant 0 : i32
    %6 = vector.broadcast %c0_i32_0 : i32 to vector<128x1xi32>
    %7 = arith.cmpi ne, %5, %6 : vector<128x1xi32>
    %c0_i32_1 = arith.constant 0 : i32
    %8 = vector.broadcast %c0_i32_1 : i32 to vector<128x1xi32>
    %9 = arith.cmpi slt, %5, %8 : vector<128x1xi32>
    %c0_i32_2 = arith.constant 0 : i32
    %10 = arith.cmpi slt, %3, %c0_i32_2 : i32
    %11 = vector.broadcast %10 : i1 to vector<128x1xi1>
    %12 = vector.broadcast %11 : vector<128x1xi1> to vector<128x1xi1>
    %13 = arith.xori %9, %12 : vector<128x1xi1>
    %14 = arith.andi %13, %7 : vector<128x1xi1>
    %15 = vector.broadcast %3 : i32 to vector<128x1xi32>
    %16 = arith.addi %5, %15 : vector<128x1xi32>
    %17 = arith.select %14, %16, %5 : vector<128x1xi1>, vector<128x1xi32>
    %c0_i32_3 = arith.constant 0 : i32
    %18 = vector.broadcast %c0_i32_3 : i32 to vector<128x1xi32>
    %19 = arith.cmpi ne, %17, %18 : vector<128x1xi32>
    %c15_i32 = arith.constant 15 : i32
    %20 = vector.broadcast %c15_i32 : i32 to vector<128x1xi32>
    %21 = arith.cmpi ne, %17, %20 : vector<128x1xi32>
    %cst = arith.constant 0.000000e+00 : f32
    %22 = vector.broadcast %cst : f32 to vector<128x128xf32>
    %c0_i32_4 = arith.constant 0 : i32
    %23 = arith.addi %0, %c0_i32_4 : i32
    %c0_i32_5 = arith.constant 0 : i32
    %24 = arith.addi %23, %c0_i32_5 : i32
    %c0 = arith.constant 0 : index
    %25 = arith.index_cast %24 : i32 to index
    %c0_6 = arith.constant 0 : index
    %26 = vector.load %arg2[%c0, %25, %c0_6] : memref<1x290x128xf32, #tpu.memory_space<vmem>>, vector<1x128x128xf32>
    %27 = vector.shape_cast %26 : vector<1x128x128xf32> to vector<128x128xf32>
    %cst_7 = arith.constant 0.000000e+00 : f32
    %28 = vector.shape_cast %19 : vector<128x1xi1> to vector<128x1xi1>
    %29 = vector.broadcast %28 : vector<128x1xi1> to vector<128x128xi1>
    %30 = vector.broadcast %cst_7 : f32 to vector<128x128xf32>
    %31 = arith.select %29, %27, %30 : vector<128x128xi1>, vector<128x128xf32>
    %32 = arith.truncf %31 : vector<128x128xf32> to vector<128x128xbf16>
    %c0_8 = arith.constant 0 : index
    %c0_9 = arith.constant 0 : index
    %c0_10 = arith.constant 0 : index
    %33 = vector.load %arg3[%c0_8, %c0_9, %c0_10] : memref<9x128x128xbf16, #tpu.memory_space<vmem>>, vector<1x128x128xbf16>
    %34 = vector.shape_cast %33 : vector<1x128x128xbf16> to vector<128x128xbf16>
    %cst_11 = arith.constant dense<0.000000e+00> : vector<128x128xf32>
    %35 = tpu.matmul %32, %34, %cst_11 {dimension_numbers = #tpu.dot_dimension_numbers<[1], [0], [0], [1], [0, 0, 1, 1], [], []>} : vector<128x128xbf16>, vector<128x128xbf16>, vector<128x128xf32> -> vector<128x128xf32>
    %36 = arith.addf %22, %35 : vector<128x128xf32>
    %c0_i32_12 = arith.constant 0 : i32
    %37 = arith.addi %0, %c0_i32_12 : i32
    %c1_i32_13 = arith.constant 1 : i32
    %38 = arith.addi %37, %c1_i32_13 : i32
    %c0_14 = arith.constant 0 : index
    %39 = arith.index_cast %38 : i32 to index
    %c0_15 = arith.constant 0 : index
    %40 = vector.load %arg2[%c0_14, %39, %c0_15] : memref<1x290x128xf32, #tpu.memory_space<vmem>>, vector<1x128x128xf32>
    %41 = vector.shape_cast %40 : vector<1x128x128xf32> to vector<128x128xf32>
    %42 = arith.truncf %41 : vector<128x128xf32> to vector<128x128xbf16>
    %c1 = arith.constant 1 : index
    %c0_16 = arith.constant 0 : index
    %c0_17 = arith.constant 0 : index
    %43 = vector.load %arg3[%c1, %c0_16, %c0_17] : memref<9x128x128xbf16, #tpu.memory_space<vmem>>, vector<1x128x128xbf16>
    %44 = vector.shape_cast %43 : vector<1x128x128xbf16> to vector<128x128xbf16>
    %cst_18 = arith.constant dense<0.000000e+00> : vector<128x128xf32>
    %45 = tpu.matmul %42, %44, %cst_18 {dimension_numbers = #tpu.dot_dimension_numbers<[1], [0], [0], [1], [0, 0, 1, 1], [], []>} : vector<128x128xbf16>, vector<128x128xbf16>, vector<128x128xf32> -> vector<128x128xf32>
    %46 = arith.addf %36, %45 : vector<128x128xf32>
    %c0_i32_19 = arith.constant 0 : i32
    %47 = arith.addi %0, %c0_i32_19 : i32
    %c2_i32 = arith.constant 2 : i32
    %48 = arith.addi %47, %c2_i32 : i32
    %c0_20 = arith.constant 0 : index
    %49 = arith.index_cast %48 : i32 to index
    %c0_21 = arith.constant 0 : index
    %50 = vector.load %arg2[%c0_20, %49, %c0_21] : memref<1x290x128xf32, #tpu.memory_space<vmem>>, vector<1x128x128xf32>
    %51 = vector.shape_cast %50 : vector<1x128x128xf32> to vector<128x128xf32>
    %cst_22 = arith.constant 0.000000e+00 : f32
    %52 = vector.shape_cast %21 : vector<128x1xi1> to vector<128x1xi1>
    %53 = vector.broadcast %52 : vector<128x1xi1> to vector<128x128xi1>
    %54 = vector.broadcast %cst_22 : f32 to vector<128x128xf32>
    %55 = arith.select %53, %51, %54 : vector<128x128xi1>, vector<128x128xf32>
    %56 = arith.truncf %55 : vector<128x128xf32> to vector<128x128xbf16>
    %c2 = arith.constant 2 : index
    %c0_23 = arith.constant 0 : index
    %c0_24 = arith.constant 0 : index
    %57 = vector.load %arg3[%c2, %c0_23, %c0_24] : memref<9x128x128xbf16, #tpu.memory_space<vmem>>, vector<1x128x128xbf16>
    %58 = vector.shape_cast %57 : vector<1x128x128xbf16> to vector<128x128xbf16>
    %cst_25 = arith.constant dense<0.000000e+00> : vector<128x128xf32>
    %59 = tpu.matmul %56, %58, %cst_25 {dimension_numbers = #tpu.dot_dimension_numbers<[1], [0], [0], [1], [0, 0, 1, 1], [], []>} : vector<128x128xbf16>, vector<128x128xbf16>, vector<128x128xf32> -> vector<128x128xf32>
    %60 = arith.addf %46, %59 : vector<128x128xf32>
    %c16_i32_26 = arith.constant 16 : i32
    %61 = arith.addi %0, %c16_i32_26 : i32
    %c0_i32_27 = arith.constant 0 : i32
    %62 = arith.addi %61, %c0_i32_27 : i32
    %c0_28 = arith.constant 0 : index
    %63 = arith.index_cast %62 : i32 to index
    %c0_29 = arith.constant 0 : index
    %64 = vector.load %arg2[%c0_28, %63, %c0_29] : memref<1x290x128xf32, #tpu.memory_space<vmem>>, vector<1x128x128xf32>
    %65 = vector.shape_cast %64 : vector<1x128x128xf32> to vector<128x128xf32>
    %cst_30 = arith.constant 0.000000e+00 : f32
    %66 = vector.shape_cast %19 : vector<128x1xi1> to vector<128x1xi1>
    %67 = vector.broadcast %66 : vector<128x1xi1> to vector<128x128xi1>
    %68 = vector.broadcast %cst_30 : f32 to vector<128x128xf32>
    %69 = arith.select %67, %65, %68 : vector<128x128xi1>, vector<128x128xf32>
    %70 = arith.truncf %69 : vector<128x128xf32> to vector<128x128xbf16>
    %c3 = arith.constant 3 : index
    %c0_31 = arith.constant 0 : index
    %c0_32 = arith.constant 0 : index
    %71 = vector.load %arg3[%c3, %c0_31, %c0_32] : memref<9x128x128xbf16, #tpu.memory_space<vmem>>, vector<1x128x128xbf16>
    %72 = vector.shape_cast %71 : vector<1x128x128xbf16> to vector<128x128xbf16>
    %cst_33 = arith.constant dense<0.000000e+00> : vector<128x128xf32>
    %73 = tpu.matmul %70, %72, %cst_33 {dimension_numbers = #tpu.dot_dimension_numbers<[1], [0], [0], [1], [0, 0, 1, 1], [], []>} : vector<128x128xbf16>, vector<128x128xbf16>, vector<128x128xf32> -> vector<128x128xf32>
    %74 = arith.addf %60, %73 : vector<128x128xf32>
    %c16_i32_34 = arith.constant 16 : i32
    %75 = arith.addi %0, %c16_i32_34 : i32
    %c1_i32_35 = arith.constant 1 : i32
    %76 = arith.addi %75, %c1_i32_35 : i32
    %c0_36 = arith.constant 0 : index
    %77 = arith.index_cast %76 : i32 to index
    %c0_37 = arith.constant 0 : index
    %78 = vector.load %arg2[%c0_36, %77, %c0_37] : memref<1x290x128xf32, #tpu.memory_space<vmem>>, vector<1x128x128xf32>
    %79 = vector.shape_cast %78 : vector<1x128x128xf32> to vector<128x128xf32>
    %80 = arith.truncf %79 : vector<128x128xf32> to vector<128x128xbf16>
    %c4 = arith.constant 4 : index
    %c0_38 = arith.constant 0 : index
    %c0_39 = arith.constant 0 : index
    %81 = vector.load %arg3[%c4, %c0_38, %c0_39] : memref<9x128x128xbf16, #tpu.memory_space<vmem>>, vector<1x128x128xbf16>
    %82 = vector.shape_cast %81 : vector<1x128x128xbf16> to vector<128x128xbf16>
    %cst_40 = arith.constant dense<0.000000e+00> : vector<128x128xf32>
    %83 = tpu.matmul %80, %82, %cst_40 {dimension_numbers = #tpu.dot_dimension_numbers<[1], [0], [0], [1], [0, 0, 1, 1], [], []>} : vector<128x128xbf16>, vector<128x128xbf16>, vector<128x128xf32> -> vector<128x128xf32>
    %84 = arith.addf %74, %83 : vector<128x128xf32>
    %c16_i32_41 = arith.constant 16 : i32
    %85 = arith.addi %0, %c16_i32_41 : i32
    %c2_i32_42 = arith.constant 2 : i32
    %86 = arith.addi %85, %c2_i32_42 : i32
    %c0_43 = arith.constant 0 : index
    %87 = arith.index_cast %86 : i32 to index
    %c0_44 = arith.constant 0 : index
    %88 = vector.load %arg2[%c0_43, %87, %c0_44] : memref<1x290x128xf32, #tpu.memory_space<vmem>>, vector<1x128x128xf32>
    %89 = vector.shape_cast %88 : vector<1x128x128xf32> to vector<128x128xf32>
    %cst_45 = arith.constant 0.000000e+00 : f32
    %90 = vector.shape_cast %21 : vector<128x1xi1> to vector<128x1xi1>
    %91 = vector.broadcast %90 : vector<128x1xi1> to vector<128x128xi1>
    %92 = vector.broadcast %cst_45 : f32 to vector<128x128xf32>
    %93 = arith.select %91, %89, %92 : vector<128x128xi1>, vector<128x128xf32>
    %94 = arith.truncf %93 : vector<128x128xf32> to vector<128x128xbf16>
    %c5 = arith.constant 5 : index
    %c0_46 = arith.constant 0 : index
    %c0_47 = arith.constant 0 : index
    %95 = vector.load %arg3[%c5, %c0_46, %c0_47] : memref<9x128x128xbf16, #tpu.memory_space<vmem>>, vector<1x128x128xbf16>
    %96 = vector.shape_cast %95 : vector<1x128x128xbf16> to vector<128x128xbf16>
    %cst_48 = arith.constant dense<0.000000e+00> : vector<128x128xf32>
    %97 = tpu.matmul %94, %96, %cst_48 {dimension_numbers = #tpu.dot_dimension_numbers<[1], [0], [0], [1], [0, 0, 1, 1], [], []>} : vector<128x128xbf16>, vector<128x128xbf16>, vector<128x128xf32> -> vector<128x128xf32>
    %98 = arith.addf %84, %97 : vector<128x128xf32>
    %c32_i32 = arith.constant 32 : i32
    %99 = arith.addi %0, %c32_i32 : i32
    %c0_i32_49 = arith.constant 0 : i32
    %100 = arith.addi %99, %c0_i32_49 : i32
    %c0_50 = arith.constant 0 : index
    %101 = arith.index_cast %100 : i32 to index
    %c0_51 = arith.constant 0 : index
    %102 = vector.load %arg2[%c0_50, %101, %c0_51] : memref<1x290x128xf32, #tpu.memory_space<vmem>>, vector<1x128x128xf32>
    %103 = vector.shape_cast %102 : vector<1x128x128xf32> to vector<128x128xf32>
    %cst_52 = arith.constant 0.000000e+00 : f32
    %104 = vector.shape_cast %19 : vector<128x1xi1> to vector<128x1xi1>
    %105 = vector.broadcast %104 : vector<128x1xi1> to vector<128x128xi1>
    %106 = vector.broadcast %cst_52 : f32 to vector<128x128xf32>
    %107 = arith.select %105, %103, %106 : vector<128x128xi1>, vector<128x128xf32>
    %108 = arith.truncf %107 : vector<128x128xf32> to vector<128x128xbf16>
    %c6 = arith.constant 6 : index
    %c0_53 = arith.constant 0 : index
    %c0_54 = arith.constant 0 : index
    %109 = vector.load %arg3[%c6, %c0_53, %c0_54] : memref<9x128x128xbf16, #tpu.memory_space<vmem>>, vector<1x128x128xbf16>
    %110 = vector.shape_cast %109 : vector<1x128x128xbf16> to vector<128x128xbf16>
    %cst_55 = arith.constant dense<0.000000e+00> : vector<128x128xf32>
    %111 = tpu.matmul %108, %110, %cst_55 {dimension_numbers = #tpu.dot_dimension_numbers<[1], [0], [0], [1], [0, 0, 1, 1], [], []>} : vector<128x128xbf16>, vector<128x128xbf16>, vector<128x128xf32> -> vector<128x128xf32>
    %112 = arith.addf %98, %111 : vector<128x128xf32>
    %c32_i32_56 = arith.constant 32 : i32
    %113 = arith.addi %0, %c32_i32_56 : i32
    %c1_i32_57 = arith.constant 1 : i32
    %114 = arith.addi %113, %c1_i32_57 : i32
    %c0_58 = arith.constant 0 : index
    %115 = arith.index_cast %114 : i32 to index
    %c0_59 = arith.constant 0 : index
    %116 = vector.load %arg2[%c0_58, %115, %c0_59] : memref<1x290x128xf32, #tpu.memory_space<vmem>>, vector<1x128x128xf32>
    %117 = vector.shape_cast %116 : vector<1x128x128xf32> to vector<128x128xf32>
    %118 = arith.truncf %117 : vector<128x128xf32> to vector<128x128xbf16>
    %c7 = arith.constant 7 : index
    %c0_60 = arith.constant 0 : index
    %c0_61 = arith.constant 0 : index
    %119 = vector.load %arg3[%c7, %c0_60, %c0_61] : memref<9x128x128xbf16, #tpu.memory_space<vmem>>, vector<1x128x128xbf16>
    %120 = vector.shape_cast %119 : vector<1x128x128xbf16> to vector<128x128xbf16>
    %cst_62 = arith.constant dense<0.000000e+00> : vector<128x128xf32>
    %121 = tpu.matmul %118, %120, %cst_62 {dimension_numbers = #tpu.dot_dimension_numbers<[1], [0], [0], [1], [0, 0, 1, 1], [], []>} : vector<128x128xbf16>, vector<128x128xbf16>, vector<128x128xf32> -> vector<128x128xf32>
    %122 = arith.addf %112, %121 : vector<128x128xf32>
    %c32_i32_63 = arith.constant 32 : i32
    %123 = arith.addi %0, %c32_i32_63 : i32
    %c2_i32_64 = arith.constant 2 : i32
    %124 = arith.addi %123, %c2_i32_64 : i32
    %c0_65 = arith.constant 0 : index
    %125 = arith.index_cast %124 : i32 to index
    %c0_66 = arith.constant 0 : index
    %126 = vector.load %arg2[%c0_65, %125, %c0_66] : memref<1x290x128xf32, #tpu.memory_space<vmem>>, vector<1x128x128xf32>
    %127 = vector.shape_cast %126 : vector<1x128x128xf32> to vector<128x128xf32>
    %cst_67 = arith.constant 0.000000e+00 : f32
    %128 = vector.shape_cast %21 : vector<128x1xi1> to vector<128x1xi1>
    %129 = vector.broadcast %128 : vector<128x1xi1> to vector<128x128xi1>
    %130 = vector.broadcast %cst_67 : f32 to vector<128x128xf32>
    %131 = arith.select %129, %127, %130 : vector<128x128xi1>, vector<128x128xf32>
    %132 = arith.truncf %131 : vector<128x128xf32> to vector<128x128xbf16>
    %c8 = arith.constant 8 : index
    %c0_68 = arith.constant 0 : index
    %c0_69 = arith.constant 0 : index
    %133 = vector.load %arg3[%c8, %c0_68, %c0_69] : memref<9x128x128xbf16, #tpu.memory_space<vmem>>, vector<1x128x128xbf16>
    %134 = vector.shape_cast %133 : vector<1x128x128xbf16> to vector<128x128xbf16>
    %cst_70 = arith.constant dense<0.000000e+00> : vector<128x128xf32>
    %135 = tpu.matmul %132, %134, %cst_70 {dimension_numbers = #tpu.dot_dimension_numbers<[1], [0], [0], [1], [0, 0, 1, 1], [], []>} : vector<128x128xbf16>, vector<128x128xbf16>, vector<128x128xf32> -> vector<128x128xf32>
    %136 = arith.addf %122, %135 : vector<128x128xf32>
    %c0_71 = arith.constant 0 : index
    %c0_72 = arith.constant 0 : index
    %137 = vector.load %arg4[%c0_71, %c0_72] : memref<1x128xf32, #tpu.memory_space<vmem>>, vector<1x128xf32>
    %138 = vector.broadcast %137 : vector<1x128xf32> to vector<128x128xf32>
    %139 = arith.addf %136, %138 : vector<128x128xf32>
    %cst_73 = arith.constant 0.000000e+00 : f32
    %140 = vector.broadcast %cst_73 : f32 to vector<128x128xf32>
    %141 = arith.maximumf %139, %140 : vector<128x128xf32>
    %c0_74 = arith.constant 0 : index
    %c0_75 = arith.constant 0 : index
    %c0_76 = arith.constant 0 : index
    %142 = vector.load %arg5[%c0_74, %c0_75, %c0_76] : memref<1x128x128xf32, #tpu.memory_space<vmem>>, vector<1x128x128xf32>
    %143 = vector.shape_cast %142 : vector<1x128x128xf32> to vector<128x128xf32>
    %144 = vector.shape_cast %141 : vector<128x128xf32> to vector<1x128x128xf32>
    tpu.vector_store %arg5[%c0_74, %c0_75, %c0_76], %144 {strides = array<i32>} : memref<1x128x128xf32, #tpu.memory_space<vmem>>, vector<1x128x128xf32>,
    return
  }
  func.func @transform_0(%arg0: i32, %arg1: i32) -> (i32, i32, i32) {
    %c0_i32 = arith.constant 0 : i32
    %c0_i32_0 = arith.constant 0 : i32
    %c0_i32_1 = arith.constant 0 : i32
    return %arg0, %c0_i32, %c0_i32_0 : i32, i32, i32
  }
  func.func @transform_1(%arg0: i32, %arg1: i32) -> (i32, i32, i32) {
    %c0_i32 = arith.constant 0 : i32
    %c0_i32_0 = arith.constant 0 : i32
    %c0_i32_1 = arith.constant 0 : i32
    %c0_i32_2 = arith.constant 0 : i32
    return %c0_i32, %c0_i32_0, %c0_i32_1 : i32, i32, i32
  }
  func.func @transform_2(%arg0: i32, %arg1: i32) -> (i32, i32) {
    %c0_i32 = arith.constant 0 : i32
    %c0_i32_0 = arith.constant 0 : i32
    %c0_i32_1 = arith.constant 0 : i32
    return %c0_i32, %c0_i32_0 : i32, i32
  }
  func.func @transform_3(%arg0: i32, %arg1: i32) -> (i32, i32, i32) {
    %c0_i32 = arith.constant 0 : i32
    %c0_i32_0 = arith.constant 0 : i32
    return %arg0, %arg1, %c0_i32 : i32, i32, i32
  }
}

</mosaic_0001>

<bundles_post_ra>
// kernel: tpu_custom_call.1
= control target key start
LH: loop header
LB: loop body
LE: loop exit
PB: predicated region body
PF: predicated region fallthrough
CT: control target
= control target key end

     0   :  { %8 = vsyncpa [#allocation3], 0  ;;  %s3966_s0 = inlined_call_operand.vmem [shape: f32[2,290,128], index: 0, kind: input, shape index: {}]   ;;  %s3967_s1 = inlined_call_operand.vmem [shape: bf16[9,128,128], index: 1, kind: input, shape index: {}]   ;;  %s3968_s2 = inlined_call_operand.vmem [shape: f32[1,128], index: 2, kind: input, shape index: {}]   ;;  %s3969_s3 = inlined_call_operand.hbm [shape: f32[2,256,128], index: 3, kind: output, shape index: {}]  }
   0x1   :  { %10 = vsyncpa [#allocation3 + $0x1], 0  ;;  %s3129_s12 = smov 0   ;;  %s3131_s13 = smov 0  }
   0x2   :  { %s3133_s14 = smov 0   ;;  %s3135_s15 = smov 0  }
   0x3   :  { %s3137_s16 = smov 0   ;;  %s3139_s17 = smov 0  }
   0x4   :  { %s3141_s18 = smov 0   ;;  %s3143_s19 = smov 0  }
   0x5 LB: > { %s2128_s20 = sadd.s32 4294967295, %s3104_s19   ;;  %s2129_s21 = sadd.s32 4294967294, %s3104_s19   ;;  %s3104_s19 = sphi %s3143_s19, %s16_s19   ;;  %s3100_s18 = sphi %s3141_s18, %s4019_s18   ;;  %s3096_s17 = sphi %s3139_s17, %s4018_s17   ;;  %s3092_s16 = sphi %s3137_s16, %s4017_s16   ;;  %s3088_s15 = sphi %s3135_s15, %s4016_s15   ;;  %s3084_s14 = sphi %s3133_s14, %s4015_s14   ;;  %s3080_s13 = sphi %s3131_s13, %s4014_s13   ;;  %s3076_s12 = sphi %s3129_s12, %s4013_s12  }
   0x6   : > { %s25_s22 = sadd.s32 1, %s3096_s17  ;;  %s28_s23 = sadd.s32 1, %s3100_s18 }
   0x7   : > { %p26_p0 = scmp.ge.s32.totalorder %s25_s22, 2  ;;  %p115_p1 = scmp.ne.s32.totalorder %s3084_s14, %s3080_s13 }
   0x8   : > { %p116_p2 = scmp.eq.s32.totalorder %s2128_s20, 3  ;;  %p121_p5 = scmp.ne.s32.totalorder %s3080_s13, %s3076_s12 }
   0x9   : > { %s4021_s22 = smov (%p26_p0, %s25_s22), 0  ;;  %s4023_s23 = smov (!%p26_p0, %s28_s23), %s3100_s18 }
   0xa   : > { %s101_s24 = ssub.s32 %s3096_s17, %s4021_s22  ;;  %p3180_p3 = por %p116_p2, %p115_p1 }
   0xb   : > { %p30_p4 = scmp.ge.s32.totalorder %s4023_s23, 2  ;;  %p122_p6 = scmp.eq.s32.totalorder %s2129_s21, 3 }
   0xc   : > { %p2132_p7 = scmp.ge.s32.totalorder %s3104_s19, 1  ;;  %p154_p9 = scmp.lt.s32.totalorder %s3104_s19, 5 }
   0xd   : > { %s4025_s23 = smov (%p30_p4, %s4023_s23), 0  ;;  %p3189_p8 = por %p122_p6, %p121_p5 }
   0xe   : > { %s100_s27 = ssub.s32 %s3100_s18, %s4025_s23  ;;  %s105_s28 = sadd.s32 1, %s3084_s14 }
   0xf   : > { %s102_s29 = sor.u32 %s101_s24, %s100_s27  ;;  %p155_p10 = pnand %p2132_p7, %p154_p9 }
  0x10   : > { %p103_p11 = scmp.eq.s32.totalorder %s102_s29, 0  ;;  %p178_p12 = scmp.lt.s32.totalorder (!%p155_p10), %s3092_s16, 1 }
  0x11   : > { %158 = sbr.rel (%p155_p10) target bundleno = 480 (0x1e0), region = 32  ;;  %s2135_s7 = sshll.u32 (!%p155_p10), %s3088_s15, 7 }
  0x12   : > { %s3198_s30 = scalar_select %p103_p11, %s3084_s14, %s105_s28  }
  0x13   : > { %s2834_s28 = sshll.u32 (!%p155_p10), %s3092_s16, 5 }
  0x16   : > { %v2853_v0 = vld [vmem:[%s3967_s1 + $0x78] sm:$0xff]  ;;  %v2852_v1 = vld [vmem:[%s3967_s1 + $0x70] sm:$0xff]  ;;  %v2851_v2 = vld [vmem:[%s3967_s1 + $0x68] sm:$0xff]  ;;  %s179_s20 = scalar_select %p178_p12, %s3092_s16, 1  ;;  %v185_v44 = vlaneseq  ;;  %vm3106_vm2 = vmmov 1  }
  0x17   : > { %2910 = vmatpush.bf16.msra.mxu1 %v2853_v0  ;;  %2911 = vmatpush.bf16.msra.mxu2 %v2853_v0  ;;  %v2850_v3 = vld [vmem:[%s3967_s1 + $0x60] sm:$0xff]  ;;  %v2849_v4 = vld [vmem:[%s3967_s1 + $0x58] sm:$0xff]  ;;  %v2848_v5 = vld [vmem:[%s3967_s1 + $0x50] sm:$0xff] }
  0x18   : > { %2912 = vmatpush.bf16.msra.mxu3 %v2853_v0  ;;  %606 = vmatpush.bf16.msra.mxu0 %v2853_v0  ;;  %s2934_s27 = smul.u32 296, %s179_s20  ;;  %v2847_v6 = vld [vmem:[%s3967_s1 + $0x48] sm:$0xff]  ;;  %v2846_v7 = vld [vmem:[%s3967_s1 + $0x40] sm:$0xff]  ;;  %v2861_v16 = vld [vmem:[%s3967_s1 + $0xb8] sm:$0xff]  ;;  %v3325_v53 = vshrl.u32 %v185_v44, 7 }
  0x19   : > { %v2845_v17 = vld [vmem:[%s3967_s1 + $0x38] sm:$0xff]  ;;  %v2860_v24 = vld [vmem:[%s3967_s1 + $0xb0] sm:$0xff]  ;;  %v2859_v28 = vld [vmem:[%s3967_s1 + $0xa8] sm:$0xff] }
  0x1a   : > { %s182_s6 = scalar_lea.vmem %s3966_s0, %s2934_s27  ;;  %v2869_v22 = vld [vmem:[%s3967_s1 + $0xf8] sm:$0xff]  ;;  %v2844_v25 = vld [vmem:[%s3967_s1 + $0x30] sm:$0xff]  ;;  %v2843_v29 = vld [vmem:[%s3967_s1 + $0x28] sm:$0xff]  ;;  %v187_v58 = vadd.s32 8, %v3325_v53  ;;  %v206_v61 = vand.u32 15, %v3325_v53  ;;  %v190_v44 = vadd.s32 32, %v3325_v53 }
  0x1b   : > { %2913 = vmatpush.bf16.msra.mxu1 %v2852_v1  ;;  %2914 = vmatpush.bf16.msra.mxu2 %v2852_v1  ;;  %s3227_s10 = scalar_lea.vmem %s182_s6, %s2135_s7  ;;  %v2877_v23 = vld [vmem:[%s3967_s1 + $0x138] sm:$0xff]  ;;  %v2868_v26 = vld [vmem:[%s3967_s1 + $0xf0] sm:$0xff]  ;;  %v2867_v30 = vld [vmem:[%s3967_s1 + $0xe8] sm:$0xff]  ;;  %s2833_s27 = sshll.u32 %s3088_s15, 4 }
  0x1c   : > { %2915 = vmatpush.bf16.msra.mxu3 %v2852_v1  ;;  %607 = vmatpush.bf16.msra.mxu0 %v2852_v1  ;;  %v2141_v8 = vld [vmem:[%s3227_s10 + $0x21] sm:$0xff]  ;;  %v2142_v9 = vld [vmem:[%s3227_s10 + $0x29] sm:$0xff]  ;;  %v2143_v36 = vld [vmem:[%s3227_s10 + $0x31] sm:$0xff]  ;;  %v213_v0 = vand.u32 15, %v187_v58  ;;  %vm3373_vm0 = vcmp.ne.s32.totalorder %v206_v61, 0  ;;  %s2020_s29 = sadd.s32 %s2834_s28, %s2833_s27  ;;  %s3030_s27 = scalar_lea.hbm %s3969_s3, 512 }
  0x1d   : > { %v2145_v10 = vld [vmem:[%s3227_s10 + $0x41] sm:$0xff]  ;;  %v2146_v11 = vld [vmem:[%s3227_s10 + $0x49] sm:$0xff]  ;;  %v3246_v18 = vpack.c.bf16 %v2142_v9, %v2141_v8  ;;  %v2144_v37 = vld [vmem:[%s3227_s10 + $0x39] sm:$0xff]  ;;  %s2835_s4 = sshll.u32 %s2020_s29, 3 }
  0x1e   : > { %v2149_v12 = vld [vmem:[%s3227_s10 + $0x61] sm:$0xff]  ;;  %v2150_v13 = vld [vmem:[%s3227_s10 + $0x69] sm:$0xff]  ;;  %v3248_v19 = vpack.c.bf16 %v2146_v11, %v2145_v10  ;;  %v2147_v38 = vld [vmem:[%s3227_s10 + $0x51] sm:$0xff]  ;;  %v3311_v47 = vpack.c.bf16 %v2144_v37, %v2143_v36  ;;  %vm411_vm1 = vcmp.ne.s32.totalorder %v213_v0, 15  ;;  %v192_v0 = vadd.s32 48, %v3325_v53  ;;  %s2022_s5 = scalar_lea.hbm %s3969_s3, %s2835_s4 }
  0x1f   : > { %2916 = vmatpush.bf16.msra.mxu1 %v2851_v2  ;;  %2917 = vmatpush.bf16.msra.mxu2 %v2851_v2  ;;  %v2137_v14 = vld [vmem:[%s3227_s10 + $0x1] sm:$0xff]  ;;  %v2138_v15 = vld [vmem:[%s3227_s10 + $0x9] sm:$0xff]  ;;  %v3250_v20 = vpack.c.bf16 %v2150_v13, %v2149_v12  ;;  %v2148_v39 = vld [vmem:[%s3227_s10 + $0x59] sm:$0xff]  ;;  %s2025_s7 = sshll.u32 %s2022_s5, 4  ;;  %s2026_s7 = int_to_ptr.hbm [resolvable:$true] %s2025_s7 }
  0x20   : > { %2918 = vmatpush.bf16.msra.mxu3 %v2851_v2  ;;  %608 = vmatpush.bf16.msra.mxu0 %v2851_v2  ;;  %v533_v21 = vpack.c.bf16 %v2138_v15, %v2137_v14  ;;  %v2876_v27 = vld [vmem:[%s3967_s1 + $0x130] sm:$0xff]  ;;  %v2875_v31 = vld [vmem:[%s3967_s1 + $0x128] sm:$0xff]  ;;  %v2858_v32 = vld [vmem:[%s3967_s1 + $0xa0] sm:$0xff]  ;;  %v3313_v48 = vpack.c.bf16 %v2148_v39, %v2147_v38  ;;  %s3024_s9 = sshra.s32 %s2026_s7, 4  ;;  %s3025_s9 = int_to_ptr.hbm [resolvable:$true] %s3024_s9 }
  0x21   : > { %v2842_v33 = vld [vmem:[%s3967_s1 + $0x20] sm:$0xff]  ;;  %v2151_v40 = vld [vmem:[%s3227_s10 + $0x71] sm:$0xff]  ;;  %v2855_v59 = vld [vmem:[%s3967_s1 + $0x88] sm:$0xff]  ;;  %s3026_s11 = scalar_lea.hbm %s3025_s9, 128  ;;  %p3031_p2 = scmp.lt.s32.totalorder %s3025_s9, %s3969_s3 }
  0x22   : > { %v2866_v34 = vld [vmem:[%s3967_s1 + $0xe0] sm:$0xff]  ;;  %v2139_v42 = vld [vmem:[%s3227_s10 + $0x11] sm:$0xff]  ;;  %v2839_v60 = vld [vmem:[%s3967_s1 + $0x8] sm:$0xff]  ;;  %p3027_p13 = scmp.ne.s32.totalorder %s3025_s9, %s3026_s11  ;;  %p3032_p4 = scmp.lt.s32.totalorder %s3030_s27, %s3026_s11 }
  0x23   : > { %2919 = vmatpush.bf16.msra.mxu1 %v2850_v3  ;;  %2920 = vmatpush.bf16.msra.mxu2 %v2850_v3  ;;  %v2874_v35 = vld [vmem:[%s3967_s1 + $0x120] sm:$0xff]  ;;  %v2857_v45 = vld [vmem:[%s3967_s1 + $0x98] sm:$0xff]  ;;  %v2856_v54 = vld [vmem:[%s3967_s1 + $0x90] sm:$0xff] }
  0x24   : > { %2921 = vmatpush.bf16.msra.mxu3 %v2850_v3  ;;  %609 = vmatpush.bf16.msra.mxu0 %v2850_v3  ;;  %v2152_v41 = vld [vmem:[%s3227_s10 + $0x79] sm:$0xff]  ;;  %v2840_v55 = vld [vmem:[%s3967_s1 + $0x10] sm:$0xff]  ;;  %v2863_v62 = vld [vmem:[%s3967_s1 + $0xc8] sm:$0xff]  ;;  %p3028_p0 = pnand %p3027_p13, %p3180_p3  ;;  %p3033_p5 = por %p3032_p4, %p3031_p2 }
  0x25   : > { %v2140_v43 = vld [vmem:[%s3227_s10 + $0x19] sm:$0xff]  ;;  %v3315_v49 = vpack.c.bf16 %v2152_v41, %v2151_v40  ;;  %v2864_v56 = vld [vmem:[%s3967_s1 + $0xd0] sm:$0xff]  ;;  %v2871_v63 = vld [vmem:[%s3967_s1 + $0x108] sm:$0xff] }
  0x26   : > { %v2841_v46 = vld [vmem:[%s3967_s1 + $0x18] sm:$0xff]  ;;  %v3317_v50 = vpack.c.bf16 %v2140_v43, %v2139_v42  ;;  %v2872_v57 = vld [vmem:[%s3967_s1 + $0x110] sm:$0xff]  ;;  %v2854_v1 = vld [vmem:[%s3967_s1 + $0x80] sm:$0xff]  ;;  %p3029_p1 = pneg %p3028_p0 }
  0x27   : > { %2922 = vmatpush.bf16.msra.mxu1 %v2849_v4  ;;  %2923 = vmatpush.bf16.msra.mxu2 %v2849_v4  ;;  %v2865_v51 = vld [vmem:[%s3967_s1 + $0xd8] sm:$0xff]  ;;  %v2838_v2 = vld [vmem:[%s3967_s1] sm:$0xff]  ;;  %v428_v8 = vld [vmem:[%s3227_s10 + $0x8] sm:$0xff] }
  0x28   : > { %2924 = vmatpush.bf16.msra.mxu3 %v2849_v4  ;;  %610 = vmatpush.bf16.msra.mxu0 %v2849_v4  ;;  %v2873_v52 = vld [vmem:[%s3967_s1 + $0x118] sm:$0xff]  ;;  %v2862_v3 = vld [vmem:[%s3967_s1 + $0xc0] sm:$0xff]  ;;  %v2259_v10 = vld [vmem:[%s3227_s10 + $0xa] sm:$0xff]  ;;  %p3034_p6 = pnand %p3033_p5, %p3029_p1 }
  0x29   : > { %v427_v4 = vld [vmem:[%s3227_s10] sm:$0xff]  ;;  %v2347_v12 = vld [vmem:[%s3227_s10 + $0x10] sm:$0xff]  ;;  %v2348_v13 = vld [vmem:[%s3227_s10 + $0x18] sm:$0xff] }
  0x2a   : > { %v2258_v9 = vld [vmem:[%s3227_s10 + $0x2] sm:$0xff]  ;;  %v2901_v14 = vld [vmem:[%s3967_s1 + $0x1f8] sm:$0xff]  ;;  %vm3394_vm3 = vmpackc.low %vm3106_vm2, %vm3373_vm0 }
  0x2b   : > { %2925 = vmatpush.bf16.msra.mxu1 %v2848_v5  ;;  %2926 = vmatpush.bf16.msra.mxu2 %v2848_v5  ;;  %v2870_v11 = vld [vmem:[%s3967_s1 + $0x100] sm:$0xff]  ;;  %v2909_v15 = vld [vmem:[%s3967_s1 + $0x238] sm:$0xff]  ;;  %vm3399_vm4 = vmpackc.low %vm411_vm1, %vm3106_vm2 }
  0x2c   : > { %2927 = vmatpush.bf16.msra.mxu3 %v2848_v5  ;;  %611 = vmatpush.bf16.msra.mxu0 %v2848_v5  ;;  %v2893_v5 = vld [vmem:[%s3967_s1 + $0x1b8] sm:$0xff]  ;;  %v2349_v38 = vld [vmem:[%s3227_s10 + $0x20] sm:$0xff]  ;;  %v2350_v39 = vld [vmem:[%s3227_s10 + $0x28] sm:$0xff] }
  0x2d   : > { %v2260_v36 = vld [vmem:[%s3227_s10 + $0x12] sm:$0xff]  ;;  %v2261_v37 = vld [vmem:[%s3227_s10 + $0x1a] sm:$0xff]  ;;  %v3452_v43 = vpack.c.bf16 %v2350_v39, %v2349_v38  ;;  %v2895_v38 = vld [vmem:[%s3967_s1 + $0x1c8] sm:$0xff]  ;;  %v197_v39 = vadd.s32 88, %v3325_v53 }
  0x2e   : > { %v3445_v41 = vpack.c.bf16 %v2261_v37, %v2260_v36  ;;  %v2351_v58 = vld [vmem:[%s3227_s10 + $0x30] sm:$0xff]  ;;  %v196_v36 = vadd.s32 80, %v3325_v53  ;;  %v2887_v37 = vld [vmem:[%s3967_s1 + $0x188] sm:$0xff] }
  0x2f   : > { %2928 = vmatpush.bf16.msra.mxu1 %v2847_v6  ;;  %2929 = vmatpush.bf16.msra.mxu2 %v2847_v6  ;;  %v2684_v40 = vld [vmem:[%s3227_s10 + $0x49] sm:$0xff] }
  0x30   : > { %2930 = vmatpush.bf16.msra.mxu3 %v2847_v6  ;;  %612 = vmatpush.bf16.msra.mxu0 %v2847_v6  ;;  %v2885_v6 = vld [vmem:[%s3967_s1 + $0x178] sm:$0xff] }
  0x33   : > { %2931 = vmatpush.bf16.msra.mxu1 %v2846_v7  ;;  %2932 = vmatpush.bf16.msra.mxu2 %v2846_v7 }
  0x34   : > { %2933 = vmatpush.bf16.msra.mxu3 %v2846_v7  ;;  %613 = vmatpush.bf16.msra.mxu0 %v2846_v7 }
  0x36   : > { %624 = vmatmul.bf16.vlgmr.msra.gmra.mxu1 %v3246_v18  ;;  %634 = vmatmul.bf16.vlgmr.msra.gmra.mxu2 %v3248_v19 }
  0x37   : > { %891 = vmatpush.bf16.msrb.mxu2 %v2861_v16  ;;  %703 = vmatpush.bf16.msrb.mxu1 %v2845_v17  ;;  %v2234_v17 = vpack.c.bf16 %v428_v8, %v427_v4  ;;  %v193_v4 = vadd.s32 56, %v3325_v53  ;;  %v2264_v8 = vld [vmem:[%s3227_s10 + $0x32] sm:$0xff] }
  0x38   : > { %644 = vmatmul.bf16.vlgmr.msra.gmra.mxu3 %v3250_v20  ;;  %614 = vmatmul.bf16.vlgmr.msra.gmra.mxu0 %v533_v21  ;;  %v2323_v21 = vpack.c.bf16 %v2259_v10, %v2258_v9  ;;  %v2265_v9 = vld [vmem:[%s3227_s10 + $0x3a] sm:$0xff] }
  0x39   : > { %1063 = vmatpush.bf16.msrb.mxu3 %v2869_v22  ;;  %1219 = vmatpush.bf16.msrb.mxu0 %v2877_v23  ;;  %v2412_v23 = vpack.c.bf16 %v2348_v13, %v2347_v12  ;;  %v255_v7 = vand.u32 15, %v193_v4  ;;  %v2353_v10 = vld [vmem:[%s3227_s10 + $0x40] sm:$0xff]  ;;  %v3528_v13 = vpack.c.bf16 %v2265_v9, %v2264_v8  ;;  %v2359_v8 = vld [vmem:[%s3227_s10 + $0x70] sm:$0xff]  ;;  %v2360_v9 = vld [vmem:[%s3227_s10 + $0x78] sm:$0xff] }
  0x3a   : > { %v2688_v12 = vld [vmem:[%s3227_s10 + $0x69] sm:$0xff] }
  0x3b   : > { %892 = vmatpush.bf16.msrb.mxu2 %v2860_v24  ;;  %704 = vmatpush.bf16.msrb.mxu1 %v2844_v25  ;;  %v2892_v24 = vld [vmem:[%s3967_s1 + $0x1b0] sm:$0xff]  ;;  %vm417_vm14 = vcmp.ne.s32.totalorder %v255_v7, 15 }
  0x3c   : > { %v2884_v25 = vld [vmem:[%s3967_s1 + $0x170] sm:$0xff]  ;;  %vm3531_vm0 = vmpackc.low %vm417_vm14, %vm3106_vm2 }
  0x3d   : > { %1064 = vmatpush.bf16.msrb.mxu3 %v2868_v26  ;;  %1220 = vmatpush.bf16.msrb.mxu0 %v2876_v27  ;;  %v2900_v26 = vld [vmem:[%s3967_s1 + $0x1f0] sm:$0xff] }
  0x3e   : > { %v2908_v27 = vld [vmem:[%s3967_s1 + $0x230] sm:$0xff] }
  0x3f   : > { %893 = vmatpush.bf16.msrb.mxu2 %v2859_v28  ;;  %705 = vmatpush.bf16.msrb.mxu1 %v2843_v29  ;;  %v188_v28 = vadd.s32 16, %v3325_v53  ;;  %v189_v29 = vadd.s32 24, %v3325_v53  ;;  %v2271_v7 = vld [vmem:[%s3227_s10 + $0x6a] sm:$0xff] }
  0x41   : > { %1065 = vmatpush.bf16.msrb.mxu3 %v2867_v30  ;;  %1221 = vmatpush.bf16.msrb.mxu0 %v2875_v31  ;;  %v2891_v30 = vld [vmem:[%s3967_s1 + $0x1a8] sm:$0xff] }
  0x42   : > { %v2883_v31 = vld [vmem:[%s3967_s1 + $0x168] sm:$0xff] }
  0x43   : > { %894 = vmatpush.bf16.msrb.mxu2 %v2858_v32  ;;  %706 = vmatpush.bf16.msrb.mxu1 %v2842_v33  ;;  %v2899_v32 = vld [vmem:[%s3967_s1 + $0x1e8] sm:$0xff] }
  0x44   : > { %v2907_v33 = vld [vmem:[%s3967_s1 + $0x228] sm:$0xff] }
  0x45   : > { %1066 = vmatpush.bf16.msrb.mxu3 %v2866_v34  ;;  %1222 = vmatpush.bf16.msrb.mxu0 %v2874_v35  ;;  %v220_v34 = vand.u32 15, %v188_v28  ;;  %v227_v35 = vand.u32 15, %v189_v29  ;;  %v2266_v28 = vld [vmem:[%s3227_s10 + $0x42] sm:$0xff]  ;;  %v2267_v29 = vld [vmem:[%s3227_s10 + $0x4a] sm:$0xff] }
  0x46   : > { %629 = vmatmul.bf16.gmra.mxu1 %v3311_v47  ;;  %639 = vmatmul.bf16.gmra.mxu2 %v3313_v48 }
  0x47   : > { %895 = vmatpush.bf16.msrb.mxu2 %v2857_v45  ;;  %707 = vmatpush.bf16.msrb.mxu1 %v2841_v46  ;;  %vm396_vm5 = vcmp.ne.s32.totalorder %v220_v34, 0  ;;  %vm413_vm6 = vcmp.ne.s32.totalorder %v227_v35, 15  ;;  %v2890_v45 = vld [vmem:[%s3967_s1 + $0x1a0] sm:$0xff] }
  0x48   : > { %649 = vmatmul.bf16.gmra.mxu3 %v3315_v49  ;;  %619 = vmatmul.bf16.gmra.mxu0 %v3317_v50  ;;  %vm3441_vm7 = vmpackc.low %vm3106_vm2, %vm396_vm5  ;;  %v2898_v46 = vld [vmem:[%s3967_s1 + $0x1e0] sm:$0xff] }
  0x49   : > { %1067 = vmatpush.bf16.msrb.mxu3 %v2865_v51  ;;  %1223 = vmatpush.bf16.msrb.mxu0 %v2873_v52  ;;  %vm3448_vm8 = vmpackc.low %vm413_vm6, %vm3106_vm2  ;;  %v191_v51 = vadd.s32 40, %v3325_v53  ;;  %v2906_v52 = vld [vmem:[%s3967_s1 + $0x220] sm:$0xff] }
  0x4b   : > { %896 = vmatpush.bf16.msrb.mxu2 %v2856_v54  ;;  %708 = vmatpush.bf16.msrb.mxu1 %v2840_v55  ;;  %v234_v54 = vand.u32 15, %v190_v44  ;;  %v241_v55 = vand.u32 15, %v191_v51  ;;  %v276_v44 = vand.u32 15, %v196_v36  ;;  %v2269_v51 = vld [vmem:[%s3227_s10 + $0x5a] sm:$0xff]  ;;  %v2272_v36 = vld [vmem:[%s3227_s10 + $0x72] sm:$0xff] }
  0x4d   : > { %1068 = vmatpush.bf16.msrb.mxu3 %v2864_v56  ;;  %1224 = vmatpush.bf16.msrb.mxu0 %v2872_v57  ;;  %vm398_vm9 = vcmp.ne.s32.totalorder %v234_v54, 0  ;;  %v2262_v56 = vld [vmem:[%s3227_s10 + $0x22] sm:$0xff]  ;;  %v2263_v57 = vld [vmem:[%s3227_s10 + $0x2a] sm:$0xff]  ;;  %vm415_vm10 = vcmp.ne.s32.totalorder %v241_v55, 15  ;;  %v3998_v55 = vmov 0 }
  0x4e   : > { %vm3482_vm11 = vmpackc.low %vm3106_vm2, %vm398_vm9  ;;  %v3486_v61 = vpack.c.bf16 %v2263_v57, %v2262_v56  ;;  %v2358_v54 = vld [vmem:[%s3227_s10 + $0x68] sm:$0xff] }
  0x4f   : > { %897 = vmatpush.bf16.msrb.mxu2 %v2855_v59  ;;  %709 = vmatpush.bf16.msrb.mxu1 %v2839_v60  ;;  %v2352_v59 = vld [vmem:[%s3227_s10 + $0x38] sm:$0xff]  ;;  %vm3489_vm12 = vmpackc.low %vm415_vm10, %vm3106_vm2  ;;  %vm404_vm10 = vcmp.ne.s32.totalorder %v276_v44, 0 }
  0x50   : > { %vm3608_vm14 = vmpackc.low %vm3106_vm2, %vm404_vm10  ;;  %v2686_v60 = vld [vmem:[%s3227_s10 + $0x59] sm:$0xff] }
  0x51   : > { %1069 = vmatpush.bf16.msrb.mxu3 %v2863_v62  ;;  %1225 = vmatpush.bf16.msrb.mxu0 %v2871_v63  ;;  %v3493_v63 = vpack.c.bf16 %v2352_v59, %v2351_v58  ;;  %v3999_v55 = vsel %vm3608_vm14, 4294967295, %v3998_v55  ;;  %v198_v59 = vadd.s32 96, %v3325_v53 }
  0x53   : > { %898 = vmatpush.bf16.msrb.mxu2 %v2854_v1  ;;  %710 = vmatpush.bf16.msrb.mxu1 %v2838_v2  ;;  %v2889_v1 = vld [vmem:[%s3967_s1 + $0x198] sm:$0xff] }
  0x54   : > { %v2897_v2 = vld [vmem:[%s3967_s1 + $0x1d8] sm:$0xff] }
  0x55   : > { %1070 = vmatpush.bf16.msrb.mxu3 %v2862_v3  ;;  %1226 = vmatpush.bf16.msrb.mxu0 %v2870_v11  ;;  %v2881_v3 = vld [vmem:[%s3967_s1 + $0x158] sm:$0xff]  ;;  %v2354_v11 = vld [vmem:[%s3227_s10 + $0x48] sm:$0xff] }
  0x56   : > { %2235 = vmatmul.msk.bf16.vlgmr.msrb.gmra.mxu1 %vm3394_vm3, %v2234_v17  ;;  %2324 = vmatmul.msk.bf16.vlgmr.msrb.gmra.mxu2 %vm3399_vm4, %v2323_v21  ;;  %v194_v17 = vadd.s32 64, %v3325_v53  ;;  %v2888_v21 = vld [vmem:[%s3967_s1 + $0x190] sm:$0xff] }
  0x57   : > { %1563 = vmatpush.bf16.msra.mxu2 %v2893_v5  ;;  %1391 = vmatpush.bf16.msra.mxu1 %v2885_v6  ;;  %v2905_v5 = vld [vmem:[%s3967_s1 + $0x218] sm:$0xff]  ;;  %v248_v6 = vand.u32 15, %v192_v0  ;;  %v2886_v0 = vld [vmem:[%s3967_s1 + $0x180] sm:$0xff] }
  0x58   : > { %2413 = vmatmul.msk.bf16.vlgmr.msrb.gmra.mxu3 %vm3394_vm3, %v2412_v23  ;;  %1227 = vmatmul.bf16.vlgmr.msrb.gmra.mxu0 %v3317_v50  ;;  %v2882_v50 = vld [vmem:[%s3967_s1 + $0x160] sm:$0xff] }
  0x59   : > { %1719 = vmatpush.bf16.msra.mxu3 %v2901_v14  ;;  %1891 = vmatpush.bf16.msra.mxu0 %v2909_v15  ;;  %vm400_vm13 = vcmp.ne.s32.totalorder %v248_v6, 0  ;;  %v3535_v15 = vpack.c.bf16 %v2354_v11, %v2353_v10  ;;  %v2270_v6 = vld [vmem:[%s3227_s10 + $0x62] sm:$0xff]  ;;  %v4002_v10 = vmov 0 }
  0x5a   : > { %vm3524_vm15 = vmpackc.low %vm3106_vm2, %vm400_vm13  ;;  %v3654_v11 = vpack.c.bf16 %v2271_v7, %v2270_v6 }
  0x5b   : > { %1564 = vmatpush.bf16.msra.mxu2 %v2892_v24  ;;  %1392 = vmatpush.bf16.msra.mxu1 %v2884_v25  ;;  %v2880_v24 = vld [vmem:[%s3967_s1 + $0x150] sm:$0xff]  ;;  %v195_v25 = vadd.s32 72, %v3325_v53 }
  0x5d   : > { %1720 = vmatpush.bf16.msra.mxu3 %v2900_v26  ;;  %1892 = vmatpush.bf16.msra.mxu0 %v2908_v27  ;;  %v262_v26 = vand.u32 15, %v194_v17  ;;  %v269_v27 = vand.u32 15, %v195_v25  ;;  %v200_v25 = vadd.s32 112, %v3325_v53 }
  0x5f   : > { %1565 = vmatpush.bf16.msra.mxu2 %v2891_v30  ;;  %1393 = vmatpush.bf16.msra.mxu1 %v2883_v31  ;;  %vm402_vm1 = vcmp.ne.s32.totalorder %v262_v26, 0  ;;  %vm419_vm5 = vcmp.ne.s32.totalorder %v269_v27, 15  ;;  %v2355_v30 = vld [vmem:[%s3227_s10 + $0x50] sm:$0xff]  ;;  %v2356_v31 = vld [vmem:[%s3227_s10 + $0x58] sm:$0xff] }
  0x60   : > { %vm3566_vm6 = vmpackc.low %vm3106_vm2, %vm402_vm1  ;;  %v3577_v35 = vpack.c.bf16 %v2356_v31, %v2355_v30 }
  0x61   : > { %1721 = vmatpush.bf16.msra.mxu3 %v2899_v32  ;;  %1893 = vmatpush.bf16.msra.mxu0 %v2907_v33  ;;  %v3570_v33 = vpack.c.bf16 %v2267_v29, %v2266_v28  ;;  %vm3573_vm9 = vmpackc.low %vm419_vm5, %vm3106_vm2  ;;  %v304_v29 = vand.u32 15, %v200_v25 }
  0x63   : > { %1566 = vmatpush.bf16.msra.mxu2 %v2890_v45  ;;  %1394 = vmatpush.bf16.msra.mxu1 %v2882_v50  ;;  %v283_v45 = vand.u32 15, %v197_v39  ;;  %v2268_v50 = vld [vmem:[%s3227_s10 + $0x52] sm:$0xff]  ;;  %v2450_v39 = vld [vmem:[%s3227_s10 + $0x81] sm:$0xff] }
  0x64   : > { %v3612_v56 = vpack.c.bf16 %v2269_v51, %v2268_v50 }
  0x65   : > { %1722 = vmatpush.bf16.msra.mxu3 %v2898_v46  ;;  %1894 = vmatpush.bf16.msra.mxu0 %v2906_v52  ;;  %v2903_v46 = vld [vmem:[%s3967_s1 + $0x208] sm:$0xff]  ;;  %vm421_vm13 = vcmp.ne.s32.totalorder %v283_v45, 15  ;;  %v2357_v52 = vld [vmem:[%s3227_s10 + $0x60] sm:$0xff] }
  0x66   : > { %2238 = vmatmul.msk.bf16.gmra.mxu1 %vm3441_vm7, %v2412_v23  ;;  %2327 = vmatmul.msk.bf16.gmra.mxu2 %vm3448_vm8, %v3445_v41  ;;  %v2896_v23 = vld [vmem:[%s3967_s1 + $0x1d0] sm:$0xff]  ;;  %vm3615_vm1 = vmpackc.low %vm421_vm13, %vm3106_vm2  ;;  %v3619_v58 = vpack.c.bf16 %v2358_v54, %v2357_v52 }
  0x67   : > { %1567 = vmatpush.bf16.msra.mxu2 %v2889_v1  ;;  %1395 = vmatpush.bf16.msra.mxu1 %v2881_v3  ;;  %v2894_v1 = vld [vmem:[%s3967_s1 + $0x1c0] sm:$0xff]  ;;  %v290_v3 = vand.u32 15, %v198_v59 }
  0x68   : > { %2416 = vmatmul.msk.bf16.gmra.mxu3 %vm3441_vm7, %v3452_v43  ;;  %1232 = vmatmul.bf16.gmra.mxu0 %v3246_v18 }
  0x69   : > { %1723 = vmatpush.bf16.msra.mxu3 %v2897_v2  ;;  %1895 = vmatpush.bf16.msra.mxu0 %v2905_v5  ;;  %v199_v2 = vadd.s32 104, %v3325_v53  ;;  %v2902_v5 = vld [vmem:[%s3967_s1 + $0x200] sm:$0xff]  ;;  %vm406_vm5 = vcmp.ne.s32.totalorder %v290_v3, 0 }
  0x6a   : > { %vm3650_vm13 = vmpackc.low %vm3106_vm2, %vm406_vm5  ;;  %vm408_vm5 = vcmp.ne.s32.totalorder %v304_v29, 0 }
  0x6b   : > { %1568 = vmatpush.bf16.msra.mxu2 %v2888_v21  ;;  %1396 = vmatpush.bf16.msra.mxu1 %v2880_v24  ;;  %v297_v4 = vand.u32 15, %v199_v2  ;;  %v4003_v10 = vsel %vm3650_vm13, 4294967295, %v4002_v10  ;;  %v4004_v21 = vmov 0 }
  0x6d   : > { %1724 = vmatpush.bf16.msra.mxu3 %v2896_v23  ;;  %vm423_vm10 = vcmp.ne.s32.totalorder %v297_v4, 15  ;;  %v3663_v23 = vpack.c.bf16 %v2360_v9, %v2359_v8 }
  0x6f   : > { %1569 = vmatpush.bf16.msra.mxu2 %v2887_v37  ;;  %v2273_v37 = vld [vmem:[%s3227_s10 + $0x7a] sm:$0xff] }
  0x71   : > { %1725 = vmatpush.bf16.msra.mxu3 %v2895_v38  ;;  %v2361_v38 = vld [vmem:[%s3227_s10 + $0x80] sm:$0xff] }
  0x73   : > { %1570 = vmatpush.bf16.msra.mxu2 %v2886_v0 }
  0x75   : > { %1726 = vmatpush.bf16.msra.mxu3 %v2894_v1 }
  0x76   : > { %2241 = vmatmul.msk.bf16.gmra.mxu1 %vm3482_vm11, %v3452_v43  ;;  %2330 = vmatmul.msk.bf16.gmra.mxu2 %vm3489_vm12, %v3486_v61 }
  0x78   : > { %2419 = vmatmul.msk.bf16.gmra.mxu3 %vm3482_vm11, %v3493_v63  ;;  %1237 = vmatmul.bf16.gmra.mxu0 %v3311_v47 }
  0x86   : > { %2244 = vmatmul.msk.bf16.gmra.mxu1 %vm3524_vm15, %v3493_v63  ;;  %2333 = vmatmul.msk.bf16.gmra.mxu2 %vm3531_vm0, %v3528_v13 }
  0x88   : > { %2422 = vmatmul.msk.bf16.gmra.mxu3 %vm3524_vm15, %v3535_v15  ;;  %1242 = vmatmul.bf16.gmra.mxu0 %v3248_v19  ;;  %v2904_v19 = vld [vmem:[%s3967_s1 + $0x210] sm:$0xff] }
  0x89   : > { %1896 = vmatpush.bf16.msra.mxu0 %v2904_v19  ;;  %v201_v19 = vadd.s32 120, %v3325_v53 }
  0x8b   : > { %v311_v31 = vand.u32 15, %v201_v19 }
  0x8d   : > { %1897 = vmatpush.bf16.msra.mxu0 %v2903_v46  ;;  %v3698_v46 = vpack.c.bf16 %v2273_v37, %v2272_v36 }
  0x91   : > { %1898 = vmatpush.bf16.msra.mxu0 %v2902_v5 }
  0x96   : > { %2247 = vmatmul.msk.bf16.gmra.mxu1 %vm3566_vm6, %v3535_v15  ;;  %2336 = vmatmul.msk.bf16.gmra.mxu2 %vm3573_vm9, %v3570_v33 }
  0x98   : > { %2425 = vmatmul.msk.bf16.gmra.mxu3 %vm3566_vm6, %v3577_v35  ;;  %1247 = vmatmul.bf16.gmra.mxu0 %v3313_v48  ;;  %v2879_v48 = vld [vmem:[%s3967_s1 + $0x148] sm:$0xff] }
  0x99   : > { %1397 = vmatpush.bf16.msra.mxu1 %v2879_v48  ;;  %v2451_v48 = vld [vmem:[%s3227_s10 + $0x89] sm:$0xff] }
  0x9a   : > { %v3709_v54 = vpack.c.bf16 %v2451_v48, %v2450_v39 }
  0xa6   : > { %2250 = vmatmul.msk.bf16.gmra.mxu1 %vm3608_vm14, %v3577_v35  ;;  %2339 = vmatmul.msk.bf16.gmra.mxu2 %vm3615_vm1, %v3612_v56 }
  0xa8   : > { %2428 = vmatmul.msk.bf16.gmra.mxu3 %vm3608_vm14, %v3619_v58  ;;  %1252 = vmatmul.bf16.gmra.mxu0 %v3250_v20  ;;  %v2878_v20 = vld [vmem:[%s3967_s1 + $0x140] sm:$0xff]  ;;  %vm3659_vm14 = vmpackc.low %vm423_vm10, %vm3106_vm2  ;;  %vm425_vm10 = vcmp.ne.s32.totalorder %v311_v31, 15 }
  0xa9   : > { %1398 = vmatpush.bf16.msra.mxu1 %v2878_v20  ;;  %v4005_v21 = vsel %vm3659_vm14, 4294967295, %v4004_v21 }
  0xb3   : > { %v3656_v17 = vpop.f32.mrf.mxu1 }
  0xb5   : > { %v615_v24 = vpop.f32.mrf.mxu0 }
  0xb6   : > { %2253 = vmatmul.msk.bf16.gmra.mxu1 %vm3650_vm13, %v3619_v58  ;;  %2342 = vmatmul.msk.bf16.gmra.mxu2 %vm3659_vm14, %v3654_v11  ;;  %vm3703_vm14 = vmpackc.low %vm425_vm10, %vm3106_vm2 }
  0xb8   : > { %2431 = vmatmul.msk.bf16.gmra.mxu3 %vm3650_vm13, %v3663_v23  ;;  %1257 = vmatmul.bf16.gmra.mxu0 %v3315_v49  ;;  %v2362_v49 = vld [vmem:[%s3227_s10 + $0x88] sm:$0xff]  ;;  %vm3694_vm13 = vmpackc.low %vm3106_vm2, %vm408_vm5  ;;  %vm4010_vm2 = vnez %v3999_v55 }
  0xb9   : > { %v3677_v26 = vpop.f32.mrf.mxu2  ;;  %v3707_v52 = vpack.c.bf16 %v2362_v49, %v2361_v38 }
  0xbb   : > { %v3679_v27 = vpop.f32.mrf.mxu3  ;;  %v3681_v28 = vpop.f32.mrf.mxu1 }
  0xbd   : > { %v617_v30 = vpop.f32.mrf.mxu0 }
  0xc1   : > { %v3689_v44 = vpop.f32.mrf.mxu2 }
  0xc3   : > { %v3691_v53 = vpop.f32.mrf.mxu3  ;;  %v3700_v50 = vpop.f32.mrf.mxu1 }
  0xc5   : > { %v620_v59 = vpop.f32.mrf.mxu0 }
  0xc6   : > { %2256 = vmatmul.msk.bf16.gmra.mxu1 %vm3694_vm13, %v3663_v23  ;;  %2345 = vmatmul.msk.bf16.gmra.mxu2 %vm3703_vm14, %v3698_v46 }
  0xc8   : > { %2434 = vmatmul.msk.bf16.gmra.mxu3 %vm3694_vm13, %v3707_v52  ;;  %1262 = vmatmul.bf16.gmra.mxu0 %v3709_v54 }
  0xc9   : > { %v3721_v0 = vpop.f32.mrf.mxu2 }
  0xcb   : > { %v3723_v1 = vpop.f32.mrf.mxu3  ;;  %v3725_v2 = vpop.f32.mrf.mxu1 }
  0xcd   : > { %v622_v20 = vpop.f32.mrf.mxu0 }
  0xd1   : > { %v3727_v3 = vpop.f32.mrf.mxu2 }
  0xd3   : > { %v3729_v4 = vpop.f32.mrf.mxu3  ;;  %v712_v5 = vpop.f32.mrf.mxu1 }
  0xd4   : > { %v713_v6 = vadd.f32 %v712_v5, %v615_v24 }
  0xd5   : > { %v1228_v7 = vpop.f32.mrf.mxu0 }
  0xd6   : > { %2567 = vmatmul.msk.bf16.vlgmr.msra.gmra.mxu1 %vm3399_vm4, %v3445_v41  ;;  %2656 = vmatmul.msk.bf16.vlgmr.msra.gmra.mxu2 %vm3394_vm3, %v3452_v43  ;;  %vm4011_vm3 = vnez %v4005_v21  ;;  %v2759_v21 = vld [vmem:[%s3227_s10 + $0x9a] sm:$0xff] }
  0xd8   : > { %1727 = vmatmul.bf16.vlgmr.msra.gmra.mxu3 %v3246_v18  ;;  %2810 = vmatmul.msk.bf16.vlgmr.msra.gmra.mxu0 %vm3399_vm4, %v3486_v61  ;;  %vm4012_vm4 = vnez %v4003_v10 }
  0xd9   : > { %v900_v8 = vpop.f32.mrf.mxu2 }
  0xda   : > { %v940_v9 = vadd.f32 %v900_v8, %v713_v6  ;;  %v2683_v8 = vld [vmem:[%s3227_s10 + $0x41] sm:$0xff] }
  0xdb   : > { %v1072_v25 = vpop.f32.mrf.mxu3  ;;  %v714_v19 = vpop.f32.mrf.mxu1 }
  0xdc   : > { %v1112_v24 = vadd.f32 %v1072_v25, %v940_v9  ;;  %v715_v29 = vadd.f32 %v714_v19, %v617_v30 }
  0xdd   : > { %v1230_v31 = vpop.f32.mrf.mxu0 }
  0xde   : > { %v3741_v36 = vadd.f32 %v1228_v7, %v1112_v24 }
  0xe1   : > { %v902_v41 = vpop.f32.mrf.mxu2 }
  0xe2   : > { %v941_v37 = vadd.f32 %v902_v41, %v715_v29 }
  0xe3   : > { %v1074_v38 = vpop.f32.mrf.mxu3  ;;  %v717_v16 = vpop.f32.mrf.mxu1 }
  0xe4   : > { %v1113_v43 = vadd.f32 %v1074_v38, %v941_v37  ;;  %v718_v18 = vadd.f32 %v717_v16, %v620_v59 }
  0xe5   : > { %v1233_v49 = vpop.f32.mrf.mxu0 }
  0xe6   : > { %2570 = vmatmul.msk.bf16.gmra.mxu1 %vm3448_vm8, %v3486_v61  ;;  %2659 = vmatmul.msk.bf16.gmra.mxu2 %vm3441_vm7, %v3493_v63  ;;  %v3749_v22 = vadd.f32 %v1230_v31, %v1113_v43 }
  0xe8   : > { %1732 = vmatmul.bf16.gmra.mxu3 %v3311_v47  ;;  %2813 = vmatmul.msk.bf16.gmra.mxu0 %vm3448_vm8, %v3528_v13  ;;  %v1648_v47 = vpack.c.bf16 %v2684_v40, %v2683_v8 }
  0xe9   : > { %v905_v30 = vpop.f32.mrf.mxu2 }
  0xea   : > { %v942_v39 = vadd.f32 %v905_v30, %v718_v18  ;;  %v2685_v18 = vld [vmem:[%s3227_s10 + $0x51] sm:$0xff] }
  0xeb   : > { %v1077_v48 = vpop.f32.mrf.mxu3  ;;  %v719_v59 = vpop.f32.mrf.mxu1 }
  0xec   : > { %v1114_v5 = vadd.f32 %v1077_v48, %v942_v39  ;;  %v720_v6 = vadd.f32 %v719_v59, %v622_v20  ;;  %v1649_v48 = vpack.c.bf16 %v2686_v60, %v2685_v18  ;;  %v2690_v18 = vld [vmem:[%s3227_s10 + $0x79] sm:$0xff] }
  0xed   : > { %v1235_v7 = vpop.f32.mrf.mxu0 }
  0xee   : > { %v3755_v61 = vadd.f32 %v1233_v49, %v1114_v5 }
  0xf1   : > { %v907_v63 = vpop.f32.mrf.mxu2 }
  0xf2   : > { %v943_v9 = vadd.f32 %v907_v63, %v720_v6 }
  0xf3   : > { %v1079_v25 = vpop.f32.mrf.mxu3  ;;  %v722_v19 = vpop.f32.mrf.mxu1 }
  0xf4   : > { %v1115_v24 = vadd.f32 %v1079_v25, %v943_v9  ;;  %v723_v42 = vadd.f32 %v722_v19, %v3656_v17  ;;  %v2687_v25 = vld [vmem:[%s3227_s10 + $0x61] sm:$0xff] }
  0xf5   : > { %v1238_v29 = vpop.f32.mrf.mxu0 }
  0xf6   : > { %2573 = vmatmul.msk.bf16.gmra.mxu1 %vm3489_vm12, %v3528_v13  ;;  %2662 = vmatmul.msk.bf16.gmra.mxu2 %vm3482_vm11, %v3535_v15  ;;  %v3766_v20 = vadd.f32 %v1235_v7, %v1115_v24 }
  0xf8   : > { %1737 = vmatmul.bf16.gmra.mxu3 %v1648_v47  ;;  %2816 = vmatmul.msk.bf16.gmra.mxu0 %vm3489_vm12, %v3570_v33 }
  0xf9   : > { %v910_v31 = vpop.f32.mrf.mxu2 }
  0xfa   : > { %v944_v41 = vadd.f32 %v910_v31, %v723_v42  ;;  %v1650_v42 = vpack.c.bf16 %v2688_v12, %v2687_v25 }
  0xfb   : > { %v1082_v17 = vpop.f32.mrf.mxu3  ;;  %v724_v37 = vpop.f32.mrf.mxu1 }
  0xfc   : > { %v1116_v38 = vadd.f32 %v1082_v17, %v944_v41  ;;  %v725_v16 = vadd.f32 %v724_v37, %v3681_v28 }
  0xfd   : > { %v1240_v43 = vpop.f32.mrf.mxu0 }
  0xfe   : > { %v3772_v13 = vadd.f32 %v1238_v29, %v1116_v38 }
 0x101   : > { %v912_v15 = vpop.f32.mrf.mxu2 }
 0x102   : > { %v945_v49 = vadd.f32 %v912_v15, %v725_v16 }
 0x103   : > { %v1084_v30 = vpop.f32.mrf.mxu3  ;;  %v727_v39 = vpop.f32.mrf.mxu1 }
 0x104   : > { %v1117_v59 = vadd.f32 %v1084_v30, %v945_v49  ;;  %v728_v62 = vadd.f32 %v727_v39, %v3700_v50 }
 0x105   : > { %v1243_v5 = vpop.f32.mrf.mxu0 }
 0x106   : > { %2576 = vmatmul.msk.bf16.gmra.mxu1 %vm3531_vm0, %v3570_v33  ;;  %2665 = vmatmul.msk.bf16.gmra.mxu2 %vm3524_vm15, %v3577_v35  ;;  %v3783_v28 = vadd.f32 %v1240_v43, %v1117_v59 }
 0x108   : > { %1742 = vmatmul.bf16.gmra.mxu3 %v1649_v48  ;;  %2819 = vmatmul.msk.bf16.gmra.mxu0 %vm3531_vm0, %v3612_v56 }
 0x109   : > { %v915_v6 = vpop.f32.mrf.mxu2 }
 0x10a   : > { %v946_v7 = vadd.f32 %v915_v6, %v728_v62 }
 0x10b   : > { %v1087_v50 = vpop.f32.mrf.mxu3  ;;  %v729_v8 = vpop.f32.mrf.mxu1 }
 0x10c   : > { %v1118_v40 = vadd.f32 %v1087_v50, %v946_v7  ;;  %v730_v63 = vadd.f32 %v729_v8, %v3725_v2  ;;  %v2757_v8 = vld [vmem:[%s3227_s10 + $0x8a] sm:$0xff] }
 0x10d   : > { %v1245_v9 = vpop.f32.mrf.mxu0 }
 0x10e   : > { %v3789_v33 = vadd.f32 %v1243_v5, %v1118_v40 }
 0x111   : > { %v917_v35 = vpop.f32.mrf.mxu2 }
 0x112   : > { %v947_v19 = vadd.f32 %v917_v35, %v730_v63 }
 0x113   : > { %v1089_v47 = vpop.f32.mrf.mxu3  ;;  %v732_v24 = vpop.f32.mrf.mxu1 }
 0x114   : > { %v1119_v29 = vadd.f32 %v1089_v47, %v947_v19  ;;  %v733_v31 = vadd.f32 %v732_v24, %v3677_v26 }
 0x115   : > { %v1248_v14 = vpop.f32.mrf.mxu0 }
 0x116   : > { %2579 = vmatmul.msk.bf16.gmra.mxu1 %vm3573_vm9, %v3612_v56  ;;  %2668 = vmatmul.msk.bf16.gmra.mxu2 %vm3566_vm6, %v3619_v58  ;;  %v3799_v2 = vadd.f32 %v1245_v9, %v1119_v29  ;;  %v2689_v58 = vld [vmem:[%s3227_s10 + $0x71] sm:$0xff] }
 0x117   : > { %v1651_v34 = vpack.c.bf16 %v2690_v18, %v2689_v58 }
 0x118   : > { %1747 = vmatmul.bf16.gmra.mxu3 %v1650_v42  ;;  %2822 = vmatmul.msk.bf16.gmra.mxu0 %vm3573_vm9, %v3654_v11 }
 0x119   : > { %v920_v41 = vpop.f32.mrf.mxu2 }
 0x11a   : > { %v948_v17 = vadd.f32 %v920_v41, %v733_v31  ;;  %v2693_v31 = vld [vmem:[%s3227_s10 + $0x91] sm:$0xff] }
 0x11b   : > { %v1092_v37 = vpop.f32.mrf.mxu3  ;;  %v734_v38 = vpop.f32.mrf.mxu1 }
 0x11c   : > { %v1120_v16 = vadd.f32 %v1092_v37, %v948_v17  ;;  %v735_v32 = vadd.f32 %v734_v38, %v3689_v44  ;;  %v2758_v17 = vld [vmem:[%s3227_s10 + $0x92] sm:$0xff] }
 0x11d   : > { %v1250_v43 = vpop.f32.mrf.mxu0  ;;  %v2830_v58 = vpack.c.bf16 %v2759_v21, %v2758_v17 }
 0x11e   : > { %v3805_v56 = vadd.f32 %v1248_v14, %v1120_v16  ;;  %v2605_v14 = vld [vmem:[%s3227_s10 + $0x98] sm:$0xff] }
 0x121   : > { %v922_v60 = vpop.f32.mrf.mxu2 }
 0x122   : > { %v949_v15 = vadd.f32 %v922_v60, %v735_v32 }
 0x123   : > { %v1094_v49 = vpop.f32.mrf.mxu3  ;;  %v737_v30 = vpop.f32.mrf.mxu1 }
 0x124   : > { %v1121_v39 = vadd.f32 %v1094_v49, %v949_v15  ;;  %v738_v48 = vadd.f32 %v737_v30, %v3721_v0 }
 0x125   : > { %v1253_v26 = vpop.f32.mrf.mxu0 }
 0x126   : > { %2582 = vmatmul.msk.bf16.gmra.mxu1 %vm3615_vm1, %v3654_v11  ;;  %2671 = vmatmul.msk.bf16.gmra.mxu2 %vm4010_vm2, %v3663_v23  ;;  %v3816_v44 = vadd.f32 %v1250_v43, %v1121_v39  ;;  %v2756_v23 = vld [vmem:[%s3227_s10 + $0x82] sm:$0xff] }
 0x127   : > { %v2827_v57 = vpack.c.bf16 %v2757_v8, %v2756_v23 }
 0x128   : > { %1752 = vmatmul.bf16.gmra.mxu3 %v1651_v34  ;;  %2825 = vmatmul.msk.bf16.gmra.mxu0 %vm3615_vm1, %v3698_v46 }
 0x129   : > { %v925_v59 = vpop.f32.mrf.mxu2 }
 0x12a   : > { %v950_v62 = vadd.f32 %v925_v59, %v738_v48 }
 0x12b   : > { %v1097_v5 = vpop.f32.mrf.mxu3  ;;  %v739_v6 = vpop.f32.mrf.mxu1 }
 0x12c   : > { %v1122_v7 = vadd.f32 %v1097_v5, %v950_v62  ;;  %v740_v55 = vadd.f32 %v739_v6, %v3727_v3 }
 0x12d   : > { %v1255_v50 = vpop.f32.mrf.mxu0 }
 0x12e   : > { %v3822_v11 = vadd.f32 %v1253_v26, %v1122_v7 }
 0x131   : > { %v927_v40 = vpop.f32.mrf.mxu2 }
 0x132   : > { %v951_v63 = vadd.f32 %v927_v40, %v740_v55 }
 0x133   : > { %v1099_v9 = vpop.f32.mrf.mxu3  ;;  %v742_v25 = vpop.f32.mrf.mxu1 }
 0x134   : > { %v1123_v12 = vadd.f32 %v1099_v9, %v951_v63  ;;  %v743_v35 = vadd.f32 %v742_v25, %v3679_v27 }
 0x135   : > { %v1258_v0 = vpop.f32.mrf.mxu0 }
 0x136   : > { %2585 = vmatmul.msk.bf16.gmra.mxu1 %vm4011_vm3, %v3698_v46  ;;  %2674 = vmatmul.msk.bf16.gmra.mxu2 %vm4012_vm4, %v3707_v52  ;;  %v3833_v3 = vadd.f32 %v1255_v50, %v1123_v12  ;;  %v2604_v52 = vld [vmem:[%s3227_s10 + $0x90] sm:$0xff] }
 0x137   : > { %v2676_v27 = vpack.c.bf16 %v2605_v14, %v2604_v52 }
 0x138   : > { %1757 = vmatmul.bf16.gmra.mxu3 %v3709_v54  ;;  %2828 = vmatmul.msk.bf16.gmra.mxu0 %vm4011_vm3, %v2827_v57  ;;  %v2694_v54 = vld [vmem:[%s3227_s10 + $0x99] sm:$0xff]  ;;  %s175_s10 = sand.u32 1, %s3080_s13  }
 0x139   : > { %v930_v19 = vpop.f32.mrf.mxu2  ;;  %v1653_v32 = vpack.c.bf16 %v2694_v54, %v2693_v31  ;;  %s2133_s21 = sshll.u32 %s175_s10, 7  ;;  %s2009_s8 = scalar_lea.sflag [#allocation3], %s175_s10 }
 0x13a   : > { %v952_v47 = vadd.f32 %v930_v19, %v743_v35  ;;  %s3873_s24 = scalar_lea.vmem [#allocation2], %s2133_s21 }
 0x13b   : > { %v1102_v24 = vpop.f32.mrf.mxu3  ;;  %v744_v46 = vpop.f32.mrf.mxu1  ;;  %s2023_s6 = sshll.u32 %s3873_s24, 4  ;;  %s2024_s6 = int_to_ptr.vmem [resolvable:$true] %s2023_s6 }
 0x13c   : > { %v1124_v42 = vadd.f32 %v1102_v24, %v952_v47  ;;  %v745_v41 = vadd.f32 %v744_v46, %v3691_v53 }
 0x13d   : > { %v1260_v29 = vpop.f32.mrf.mxu0 }
 0x13e   : > { %v3839_v10 = vadd.f32 %v1258_v0, %v1124_v42 }
 0x141   : > { %v932_v37 = vpop.f32.mrf.mxu2 }
 0x142   : > { %v953_v38 = vadd.f32 %v932_v37, %v745_v41 }
 0x143   : > { %v1104_v16 = vpop.f32.mrf.mxu3  ;;  %v747_v43 = vpop.f32.mrf.mxu1 }
 0x144   : > { %v1125_v18 = vadd.f32 %v1104_v16, %v953_v38  ;;  %v748_v53 = vadd.f32 %v747_v43, %v3723_v1 }
 0x145   : > { %v1263_v60 = vpop.f32.mrf.mxu0 }
 0x146   : > { %2588 = vmatmul.msk.bf16.gmra.mxu1 %vm3703_vm14, %v2827_v57  ;;  %2677 = vmatmul.msk.bf16.gmra.mxu2 %vm3694_vm13, %v2676_v27  ;;  %v3852_v15 = vadd.f32 %v1260_v29, %v1125_v18 }
 0x148   : > { %1762 = vmatmul.bf16.gmra.mxu3 %v1653_v32  ;;  %2831 = vmatmul.msk.bf16.gmra.mxu0 %vm3703_vm14, %v2830_v58 }
 0x149   : > { %v935_v49 = vpop.f32.mrf.mxu2 }
 0x14a   : > { %v954_v30 = vadd.f32 %v935_v49, %v748_v53 }
 0x14b   : > { %v1107_v34 = vpop.f32.mrf.mxu3  ;;  %v749_v39 = vpop.f32.mrf.mxu1 }
 0x14c   : > { %v1126_v26 = vadd.f32 %v1107_v34, %v954_v30  ;;  %v750_v45 = vadd.f32 %v749_v39, %v3729_v4  ;;  %v3867_v4 = vld [vmem:[%s3968_s2] ss:$0 sm:$0xff] }
 0x14d   : > { %v1265_v48 = vpop.f32.mrf.mxu0 }
 0x14e   : > { %v3857_v59 = vadd.f32 %v1263_v60, %v1126_v26 }
 0x151   : > { %v937_v62 = vpop.f32.mrf.mxu2 }
 0x152   : > { %v955_v5 = vadd.f32 %v937_v62, %v750_v45 }
 0x153   : > { %v1109_v6 = vpop.f32.mrf.mxu3  ;;  %v1400_v7 = vpop.f32.mrf.mxu1 }
 0x154   : > { %v1127_v51 = vadd.f32 %v1109_v6, %v955_v5  ;;  %v1440_v1 = vadd.f32 %v1400_v7, %v3741_v36 }
 0x155   : > { %v1900_v50 = vpop.f32.mrf.mxu0 }
 0x156   : > { %v3860_v55 = vadd.f32 %v1265_v48, %v1127_v51 }
 0x159   : > { %v1572_v23 = vpop.f32.mrf.mxu2 }
 0x15a   : > { %v1612_v8 = vadd.f32 %v1572_v23, %v1440_v1 }
 0x15b   : > { %v1728_v40 = vpop.f32.mrf.mxu3  ;;  %v1402_v63 = vpop.f32.mrf.mxu1 }
 0x15c   : > { %v1768_v9 = vadd.f32 %v1728_v40, %v1612_v8  ;;  %v1441_v0 = vadd.f32 %v1402_v63, %v3749_v22 }
 0x15d   : > { %v1902_v25 = vpop.f32.mrf.mxu0 }
 0x15e   : > { %v1940_v57 = vadd.f32 %v1900_v50, %v1768_v9 }
 0x160   : > { %v1960_v12 = vadd.f32 %v3867_v4, %v1940_v57 }
 0x161   : > { %v1574_v36 = vpop.f32.mrf.mxu2 }
 0x162   : > { %v1976_v35 = vmax.f32 %v1960_v12, 0.0  ;;  %v1613_v19 = vadd.f32 %v1574_v36, %v1441_v0 }
 0x163   : > { %v1730_v47 = vpop.f32.mrf.mxu3  ;;  %v1405_v24 = vpop.f32.mrf.mxu1 }
 0x164   : > { %1992 = vst [vmem:[%s3873_s24] sm:$0xff] %v1976_v35  ;;  %v1769_v46 = vadd.f32 %v1730_v47, %v1613_v19  ;;  %v1442_v14 = vadd.f32 %v1405_v24, %v3755_v61 }
 0x165   : > { %v1905_v42 = vpop.f32.mrf.mxu0 }
 0x166   : > { %v1941_v29 = vadd.f32 %v1902_v25, %v1769_v46 }
 0x168   : > { %v1961_v52 = vadd.f32 %v3867_v4, %v1941_v29 }
 0x169   : > { %v1577_v31 = vpop.f32.mrf.mxu2 }
 0x16a   : > { %v1977_v22 = vmax.f32 %v1961_v52, 0.0  ;;  %v1614_v41 = vadd.f32 %v1577_v31, %v1442_v14 }
 0x16b   : > { %v1733_v54 = vpop.f32.mrf.mxu3  ;;  %v1407_v17 = vpop.f32.mrf.mxu1 }
 0x16c   : > { %1993 = vst [vmem:[%s3873_s24 + $0x8] sm:$0xff] %v1977_v22  ;;  %v1770_v21 = vadd.f32 %v1733_v54, %v1614_v41  ;;  %v1443_v27 = vadd.f32 %v1407_v17, %v3766_v20 }
 0x16d   : > { %v1907_v37 = vpop.f32.mrf.mxu0 }
 0x16e   : > { %v1942_v38 = vadd.f32 %v1905_v42, %v1770_v21 }
 0x170   : > { %v1962_v16 = vadd.f32 %v3867_v4, %v1942_v38 }
 0x171   : > { %v1579_v43 = vpop.f32.mrf.mxu2 }
 0x172   : > { %v1978_v32 = vmax.f32 %v1962_v16, 0.0  ;;  %v1615_v58 = vadd.f32 %v1579_v43, %v1443_v27 }
 0x173   : > { %v1735_v18 = vpop.f32.mrf.mxu3  ;;  %v1410_v61 = vpop.f32.mrf.mxu1 }
 0x174   : > { %1994 = vst [vmem:[%s3873_s24 + $0x10] sm:$0xff] %v1978_v32  ;;  %v1771_v60 = vadd.f32 %v1735_v18, %v1615_v58  ;;  %v1444_v34 = vadd.f32 %v1410_v61, %v3772_v13 }
 0x175   : > { %v1910_v53 = vpop.f32.mrf.mxu0 }
 0x176   : > { %v1943_v49 = vadd.f32 %v1907_v37, %v1771_v60 }
 0x178   : > { %v1963_v30 = vadd.f32 %v3867_v4, %v1943_v49 }
 0x179   : > { %v1582_v39 = vpop.f32.mrf.mxu2 }
 0x17a   : > { %v1979_v26 = vmax.f32 %v1963_v30, 0.0  ;;  %v1616_v48 = vadd.f32 %v1582_v39, %v1444_v34 }
 0x17b   : > { %v1738_v45 = vpop.f32.mrf.mxu3  ;;  %v1412_v20 = vpop.f32.mrf.mxu1 }
 0x17c   : > { %1995 = vst [vmem:[%s3873_s24 + $0x18] sm:$0xff] %v1979_v26  ;;  %v1772_v62 = vadd.f32 %v1738_v45, %v1616_v48  ;;  %v1445_v51 = vadd.f32 %v1412_v20, %v3783_v28 }
 0x17d   : > { %v1912_v5 = vpop.f32.mrf.mxu0 }
 0x17e   : > { %v1944_v6 = vadd.f32 %v1910_v53, %v1772_v62 }
 0x180   : > { %v1964_v7 = vadd.f32 %v3867_v4, %v1944_v6 }
 0x181   : > { %v1584_v50 = vpop.f32.mrf.mxu2 }
 0x182   : > { %v1980_v1 = vmax.f32 %v1964_v7, 0.0  ;;  %v1617_v23 = vadd.f32 %v1584_v50, %v1445_v51 }
 0x183   : > { %v1740_v8 = vpop.f32.mrf.mxu3  ;;  %v1415_v13 = vpop.f32.mrf.mxu1 }
 0x184   : > { %1996 = vst [vmem:[%s3873_s24 + $0x20] sm:$0xff] %v1980_v1  ;;  %v1773_v40 = vadd.f32 %v1740_v8, %v1617_v23  ;;  %v1446_v57 = vadd.f32 %v1415_v13, %v3789_v33 }
 0x185   : > { %v1915_v63 = vpop.f32.mrf.mxu0 }
 0x186   : > { %v1945_v9 = vadd.f32 %v1912_v5, %v1773_v40 }
 0x188   : > { %v1965_v25 = vadd.f32 %v3867_v4, %v1945_v9 }
 0x189   : > { %v1587_v12 = vpop.f32.mrf.mxu2 }
 0x18a   : > { %v1981_v0 = vmax.f32 %v1965_v25, 0.0  ;;  %v1618_v36 = vadd.f32 %v1587_v12, %v1446_v57 }
 0x18b   : > { %v1743_v35 = vpop.f32.mrf.mxu3  ;;  %v1417_v28 = vpop.f32.mrf.mxu1 }
 0x18c   : > { %1997 = vst [vmem:[%s3873_s24 + $0x28] sm:$0xff] %v1981_v0  ;;  %v1774_v19 = vadd.f32 %v1743_v35, %v1618_v36  ;;  %v1447_v42 = vadd.f32 %v1417_v28, %v3799_v2 }
 0x18d   : > { %v1917_v47 = vpop.f32.mrf.mxu0 }
 0x18e   : > { %v1946_v24 = vadd.f32 %v1915_v63, %v1774_v19 }
 0x190   : > { %v1966_v46 = vadd.f32 %v3867_v4, %v1946_v24 }
 0x191   : > { %v1589_v29 = vpop.f32.mrf.mxu2 }
 0x192   : > { %v1982_v52 = vmax.f32 %v1966_v46, 0.0  ;;  %v1619_v14 = vadd.f32 %v1589_v29, %v1447_v42 }
 0x193   : > { %v1745_v31 = vpop.f32.mrf.mxu3  ;;  %v1420_v33 = vpop.f32.mrf.mxu1 }
 0x194   : > { %1998 = vst [vmem:[%s3873_s24 + $0x30] sm:$0xff] %v1982_v52  ;;  %v1775_v22 = vadd.f32 %v1745_v31, %v1619_v14  ;;  %v1448_v21 = vadd.f32 %v1420_v33, %v3805_v56 }
 0x195   : > { %v1920_v41 = vpop.f32.mrf.mxu0 }
 0x196   : > { %v1947_v54 = vadd.f32 %v1917_v47, %v1775_v22 }
 0x198   : > { %v1967_v17 = vadd.f32 %v3867_v4, %v1947_v54 }
 0x199   : > { %v1592_v37 = vpop.f32.mrf.mxu2 }
 0x19a   : > { %v1983_v38 = vmax.f32 %v1967_v17, 0.0  ;;  %v1620_v16 = vadd.f32 %v1592_v37, %v1448_v21 }
 0x19b   : > { %v1748_v27 = vpop.f32.mrf.mxu3  ;;  %v1422_v2 = vpop.f32.mrf.mxu1 }
 0x19c   : > { %1999 = vst [vmem:[%s3873_s24 + $0x38] sm:$0xff] %v1983_v38  ;;  %v1776_v43 = vadd.f32 %v1748_v27, %v1620_v16  ;;  %v1449_v61 = vadd.f32 %v1422_v2, %v3816_v44 }
 0x19d   : > { %v1922_v32 = vpop.f32.mrf.mxu0 }
 0x19e   : > { %v1948_v58 = vadd.f32 %v1920_v41, %v1776_v43 }
 0x1a0   : > { %v1968_v18 = vadd.f32 %v3867_v4, %v1948_v58 }
 0x1a1   : > { %v1594_v60 = vpop.f32.mrf.mxu2 }
 0x1a2   : > { %v1984_v53 = vmax.f32 %v1968_v18, 0.0  ;;  %v1621_v49 = vadd.f32 %v1594_v60, %v1449_v61 }
 0x1a3   : > { %v1750_v30 = vpop.f32.mrf.mxu3  ;;  %v1425_v56 = vpop.f32.mrf.mxu1 }
 0x1a4   : > { %2000 = vst [vmem:[%s3873_s24 + $0x40] sm:$0xff] %v1984_v53  ;;  %v1777_v34 = vadd.f32 %v1750_v30, %v1621_v49  ;;  %v1450_v45 = vadd.f32 %v1425_v56, %v3822_v11 }
 0x1a5   : > { %v1925_v39 = vpop.f32.mrf.mxu0 }
 0x1a6   : > { %v1949_v26 = vadd.f32 %v1922_v32, %v1777_v34 }
 0x1a8   : > { %v1969_v48 = vadd.f32 %v3867_v4, %v1949_v26 }
 0x1a9   : > { %v1597_v20 = vpop.f32.mrf.mxu2 }
 0x1aa   : > { %v1985_v62 = vmax.f32 %v1969_v48, 0.0  ;;  %v1622_v5 = vadd.f32 %v1597_v20, %v1450_v45 }
 0x1ab   : > { %v1753_v6 = vpop.f32.mrf.mxu3  ;;  %v1427_v44 = vpop.f32.mrf.mxu1 }
 0x1ac   : > { %2001 = vst [vmem:[%s3873_s24 + $0x48] sm:$0xff] %v1985_v62  ;;  %v1778_v7 = vadd.f32 %v1753_v6, %v1622_v5  ;;  %v1451_v23 = vadd.f32 %v1427_v44, %v3833_v3 }
 0x1ad   : > { %v1927_v51 = vpop.f32.mrf.mxu0 }
 0x1ae   : > { %v1950_v50 = vadd.f32 %v1925_v39, %v1778_v7 }
 0x1b0   : > { %v1970_v1 = vadd.f32 %v3867_v4, %v1950_v50 }
 0x1b1   : > { %v1599_v8 = vpop.f32.mrf.mxu2 }
 0x1b2   : > { %v1986_v13 = vmax.f32 %v1970_v1, 0.0  ;;  %v1623_v40 = vadd.f32 %v1599_v8, %v1451_v23 }
 0x1b3   : > { %v1755_v63 = vpop.f32.mrf.mxu3  ;;  %v1430_v11 = vpop.f32.mrf.mxu1 }
 0x1b4   : > { %2002 = vst [vmem:[%s3873_s24 + $0x50] sm:$0xff] %v1986_v13  ;;  %v1779_v9 = vadd.f32 %v1755_v63, %v1623_v40  ;;  %v1452_v0 = vadd.f32 %v1430_v11, %v3839_v10 }
 0x1b5   : > { %v1930_v57 = vpop.f32.mrf.mxu0 }
 0x1b6   : > { %v1951_v25 = vadd.f32 %v1927_v51, %v1779_v9 }
 0x1b8   : > { %v1971_v12 = vadd.f32 %v3867_v4, %v1951_v25 }
 0x1b9   : > { %v1602_v36 = vpop.f32.mrf.mxu2 }
 0x1ba   : > { %v1987_v35 = vmax.f32 %v1971_v12, 0.0  ;;  %v1624_v28 = vadd.f32 %v1602_v36, %v1452_v0 }
 0x1bb   : > { %v1758_v19 = vpop.f32.mrf.mxu3  ;;  %v1432_v3 = vpop.f32.mrf.mxu1 }
 0x1bc   : > { %2003 = vst [vmem:[%s3873_s24 + $0x58] sm:$0xff] %v1987_v35  ;;  %v1780_v47 = vadd.f32 %v1758_v19, %v1624_v28  ;;  %v1453_v42 = vadd.f32 %v1432_v3, %v3852_v15 }
 0x1bd   : > { %v1932_v29 = vpop.f32.mrf.mxu0 }
 0x1be   : > { %v1952_v24 = vadd.f32 %v1930_v57, %v1780_v47 }
 0x1c0   : > { %v1972_v46 = vadd.f32 %v3867_v4, %v1952_v24 }
 0x1c1   : > { %v1604_v52 = vpop.f32.mrf.mxu2 }
 0x1c2   : > { %v1988_v14 = vmax.f32 %v1972_v46, 0.0  ;;  %v1625_v10 = vadd.f32 %v1604_v52, %v1453_v42 }
 0x1c3   : > { %v1760_v31 = vpop.f32.mrf.mxu3  ;;  %v1435_v33 = vpop.f32.mrf.mxu1 }
 0x1c4   : > { %2004 = vst [vmem:[%s3873_s24 + $0x60] sm:$0xff] %v1988_v14  ;;  %v1781_v22 = vadd.f32 %v1760_v31, %v1625_v10  ;;  %v1454_v17 = vadd.f32 %v1435_v33, %v3857_v59 }
 0x1c5   : > { %v1935_v16 = vpop.f32.mrf.mxu0 }
 0x1c6   : > { %v1953_v41 = vadd.f32 %v1932_v29, %v1781_v22 }
 0x1c8   : > { %v1973_v54 = vadd.f32 %v3867_v4, %v1953_v41 }
 0x1c9   : > { %v1607_v21 = vpop.f32.mrf.mxu2 }
 0x1ca   : > { %v1989_v37 = vmax.f32 %v1973_v54, 0.0  ;;  %v1626_v38 = vadd.f32 %v1607_v21, %v1454_v17 }
 0x1cb   : > { %v1763_v15 = vpop.f32.mrf.mxu3  ;;  %v1437_v2 = vpop.f32.mrf.mxu1 }
 0x1cc   : > { %2005 = vst [vmem:[%s3873_s24 + $0x68] sm:$0xff] %v1989_v37  ;;  %v1782_v27 = vadd.f32 %v1763_v15, %v1626_v38  ;;  %v1455_v58 = vadd.f32 %v1437_v2, %v3860_v55 }
 0x1cd   : > { %v1937_v49 = vpop.f32.mrf.mxu0 }
 0x1ce   : > { %v1954_v43 = vadd.f32 %v1935_v16, %v1782_v27 }
 0x1d0   : > { %v1974_v32 = vadd.f32 %v3867_v4, %v1954_v43 }
 0x1d1   : > { %v1609_v59 = vpop.f32.mrf.mxu2 }
 0x1d2   : > { %v1990_v18 = vmax.f32 %v1974_v32, 0.0  ;;  %v1627_v61 = vadd.f32 %v1609_v59, %v1455_v58 }
 0x1d3   : > { %v1765_v60 = vpop.f32.mrf.mxu3 }
 0x1d4   : > { %2006 = vst [vmem:[%s3873_s24 + $0x70] sm:$0xff] %v1990_v18  ;;  %v1783_v53 = vadd.f32 %v1765_v60, %v1627_v61 }
 0x1d6   : > { %v1955_v30 = vadd.f32 %v1937_v49, %v1783_v53 }
 0x1d8   : > { %v1975_v55 = vadd.f32 %v3867_v4, %v1955_v30 }
 0x1da   : > { %v1991_v56 = vmax.f32 %v1975_v55, 0.0 }
 0x1dc   : > { %2007 = vst [vmem:[%s3873_s24 + $0x78] sm:$0xff] %v1991_v56 }
 0x1dd   : > { %3037 = shalt.err (!%p3034_p6)
}
 0x1de   : > { %s3107_s10 = smov 128   ;;  %s3108_s24 = smov 8  }
 0x1df   : > { %2935 = dma.vmem_to_hbm [thread:$0]  (%p3180_p3), %s2024_s6, 2048, %s2026_s7, %s2009_s8, %s3107_s10, %s3107_s10, %s3108_s24  }
 0x1e0 PF: > { %p2941_p7 = scmp.ge.s32.totalorder %s3104_s19, 2  ;;  %s2040_s4 = sand.u32 1, %s3076_s12  }
 0x1e1   : > { %s2041_s15 = scalar_lea.sflag [#allocation3], %s2040_s4 }
 0x1e2   : > { %p2938_p9 = pnand %p2941_p7, %p3189_p8 }
 0x1e4   : > { %p2939_p10 = pneg %p2938_p9 }
 0x1e6   : > { %3071 = dma.done.wait (%p2939_p10), %s2041_s15, 2048  }
 0x1e7   : > { %3073 = vsyncadd (%p2939_p10), %s2041_s15, 4294965248  ;;  %s16_s19 = sadd.s32 1, %s3104_s19   ;;  %s4013_s12 = smov %s3080_s13 }
 0x1e8   : > { %p13_p11 = scmp.ge.s32.totalorder %s16_s19, 6   ;;  %s4014_s13 = smov %s3084_s14 }
 0x1e9   : > { %s4015_s14 = smov %s3198_s30  ;;  %s4016_s15 = smov %s3096_s17 }
 0x1ea   : > { %s4017_s16 = smov %s3100_s18  ;;  %s4018_s17 = smov %s4021_s22 }
 0x1eb   : > { %s4019_s18 = smov %s4025_s23  ;;  %15 = sbr.rel (!%p13_p11) target bundleno = 5 (0x5), region = 84 }
 0x1f0   :  { %2047 = vsyncpa [#allocation3], 1 }
 0x1f1   :  { %2049 = vsyncpa [#allocation3 + $0x1], 1 }

</bundles_post_ra>
